<compile_context>
chip_gen: v7x
topology: tpu7x:2x2x1
jax: 0.10.0
libtpu: 0.0.40
codegen_flags: <defaults>
</compile_context>

<pallas_src>
import math

import jax
import jax.numpy as jnp
from jax.experimental import pallas as pl
from jax.experimental.pallas import tpu as pltpu


TILE_ROWS = 512   # node-row tile (pass 1 and pass 2)
TILE_K = 512      # neighbor (reduction) tile for A_hat @ hw

_VMEM_LIMIT = 64 * 1024 * 1024


def _elu(x):
    # ELU alpha=1.0 (PyTorch default); clamp so the discarded branch never
    # overflows under jnp.where.
    return jnp.where(x > 0, x, jnp.exp(jnp.minimum(x, 0.0)) - 1.0)


def _round_up(n, m):
    return ((n + m - 1) // m) * m


def padded_num_nodes(n, tile_rows=TILE_ROWS, tile_k=TILE_K):
    """Row/col padding of the node dimension shared by both passes."""
    return _round_up(n, math.lcm(tile_rows, tile_k))


# ---------------- Pass 1: row-tiled MLP + GCN weight transform ---------------
# hw = ELU(ELU(x @ W1 + b1) @ W2 + b2) @ Wg     (stored bf16 for pass-2 stream)
def mlp_kernel(x_ref, w1_ref, b1_ref, w2_ref, b2_ref, wg_ref, hw_ref):
    x = x_ref[...]
    h = _elu(jnp.dot(x, w1_ref[...], preferred_element_type=jnp.float32)
             + b1_ref[...])
    h = _elu(jnp.dot(h, w2_ref[...], preferred_element_type=jnp.float32)
             + b2_ref[...])
    hw = jnp.dot(h, wg_ref[...], preferred_element_type=jnp.float32)
    hw_ref[...] = hw.astype(hw_ref.dtype)


# ------- Pass 2: block-sparse A_hat @ hw with fused (+bg, ELU, @Wf, +bf) -----
def agg_kernel(kidx_ref, kcnt_ref, a_ref, hw_ref, bg_ref, wf_ref, bf_ref,
               out_ref, acc_ref):
    i = pl.program_id(0)
    k = pl.program_id(1)

    @pl.when(k == 0)
    def _():
        acc_ref[...] = jnp.zeros_like(acc_ref)

    # Only accumulate real (nonzero) adjacency blocks for this row tile.
    @pl.when(k < kcnt_ref[i])
    def _():
        acc_ref[...] += jnp.dot(a_ref[...], hw_ref[...],
                                preferred_element_type=jnp.float32)

    @pl.when(k == pl.num_programs(1) - 1)
    def _():
        g = _elu(acc_ref[...] + bg_ref[...])
        out = jnp.dot(g, wf_ref[...], preferred_element_type=jnp.float32) \
            + bf_ref[...]
        out_ref[...] = out.astype(out_ref.dtype)


def separate_gnn_forward(x, a_hat, params, *, tile_rows=TILE_ROWS,
                         tile_k=TILE_K):
    N, f_in = x.shape
    hid = params["w1"].shape[1]
    out_dim = params["wf"].shape[1]

    # Lane-dense padding: feature dims -> multiples of 128, node rows/cols ->
    # lcm(tile_rows, tile_k) so both grids agree.
    f_in_p = _round_up(f_in, 128)
    hid_p = _round_up(hid, 128)
    out_p = _round_up(out_dim, 128)
    n_p = padded_num_nodes(N, tile_rows, tile_k)
    n_row_tiles = n_p // tile_rows
    n_k_tiles = n_p // tile_k

    def pad2(a, r, c, dtype=jnp.float32):
        a = a.astype(dtype)
        return jnp.pad(a, ((0, r - a.shape[0]), (0, c - a.shape[1])))

    x_p = pad2(x, n_p, f_in_p)
    w1 = pad2(params["w1"], f_in_p, hid_p)
    b1 = pad2(params["b1"], 1, hid_p)
    w2 = pad2(params["w2"], hid_p, hid_p)
    b2 = pad2(params["b2"], 1, hid_p)
    wg = pad2(params["wg"], hid_p, hid_p)
    bg = pad2(params["bg"], 1, hid_p)
    wf = pad2(params["wf"], hid_p, out_p)
    bf = pad2(params["bf"], 1, out_p)

    # A_hat: accept a pre-padded bf16 adjacency (built once at final shape via
    # build_gcn_adjacency(pad_to=...)); otherwise cast+pad here.
    if a_hat.shape == (n_p, n_p) and a_hat.dtype == jnp.bfloat16:
        a_p = a_hat
    else:
        a_p = pad2(a_hat, n_p, n_p, dtype=jnp.bfloat16)

    # ---- Pass 1: grid over node-row tiles ("parallel" -> megacore shard) ----
    hw = pl.pallas_call(
        mlp_kernel,
        out_shape=jax.ShapeDtypeStruct((n_p, hid_p), jnp.bfloat16),
        grid=(n_row_tiles,),
        in_specs=[
            pl.BlockSpec((tile_rows, f_in_p), lambda i: (i, 0)),
            pl.BlockSpec((f_in_p, hid_p), lambda i: (0, 0)),
            pl.BlockSpec((1, hid_p), lambda i: (0, 0)),
            pl.BlockSpec((hid_p, hid_p), lambda i: (0, 0)),
            pl.BlockSpec((1, hid_p), lambda i: (0, 0)),
            pl.BlockSpec((hid_p, hid_p), lambda i: (0, 0)),
        ],
        out_specs=pl.BlockSpec((tile_rows, hid_p), lambda i: (i, 0)),
        compiler_params=pltpu.CompilerParams(
            dimension_semantics=("parallel",),
            vmem_limit_bytes=_VMEM_LIMIT),
        cost_estimate=pl.CostEstimate(
            flops=2 * n_p * (f_in_p * hid_p + 2 * hid_p * hid_p),
            transcendentals=2 * n_p * hid_p,
            bytes_accessed=4 * (n_p * f_in_p + f_in_p * hid_p
                                + 2 * hid_p * hid_p + 3 * hid_p)
                           + 2 * n_p * hid_p),
    )(x_p, w1, b1, w2, b2, wg)

    # ---- Block-sparsity metadata: compacted nonzero-K-block list per row tile
    blk = a_p.reshape(n_row_tiles, tile_rows, n_k_tiles, tile_k)
    nz = jnp.any(blk != 0, axis=(1, 3))                         # (nrt, nkt)
    kcnt = jnp.sum(nz, axis=1).astype(jnp.int32)                # (nrt,)
    order = jnp.argsort(jnp.logical_not(nz).astype(jnp.int32),
                        axis=1).astype(jnp.int32)               # nonzero first
    last = jnp.take_along_axis(order, jnp.maximum(kcnt - 1, 0)[:, None],
                               axis=1)
    pos = jnp.arange(n_k_tiles, dtype=jnp.int32)[None, :]
    # Tail entries repeat the last valid block index, so gated-off steps keep
    # the block index constant (no extra DMA) and the accumulate is skipped.
    kidx = jnp.where(pos < kcnt[:, None], order, last)          # (nrt, nkt)

    try:
        kmax = max(int(jnp.max(kcnt)), 1)
    except jax.errors.ConcretizationTypeError:
        kmax = max(n_k_tiles, 1)

    # ---- Pass 2: (row tiles) x (nonzero K blocks), f32 VMEM accumulator -----
    grid_spec = pltpu.PrefetchScalarGridSpec(
        num_scalar_prefetch=2,
        grid=(n_row_tiles, kmax),
        in_specs=[
            pl.BlockSpec((tile_rows, tile_k),
                         lambda i, k, kidx, kcnt: (i, kidx[i, k])),
            pl.BlockSpec((tile_k, hid_p),
                         lambda i, k, kidx, kcnt: (kidx[i, k], 0)),
            pl.BlockSpec((1, hid_p), lambda i, k, kidx, kcnt: (0, 0)),
            pl.BlockSpec((hid_p, out_p), lambda i, k, kidx, kcnt: (0, 0)),
            pl.BlockSpec((1, out_p), lambda i, k, kidx, kcnt: (0, 0)),
        ],
        out_specs=pl.BlockSpec((tile_rows, out_p),
                               lambda i, k, kidx, kcnt: (i, 0)),
        scratch_shapes=[pltpu.VMEM((tile_rows, hid_p), jnp.float32)],
    )

    out_padded = pl.pallas_call(
        agg_kernel,
        out_shape=jax.ShapeDtypeStruct((n_p, out_p), jnp.float32),
        grid_spec=grid_spec,
        compiler_params=pltpu.CompilerParams(
            dimension_semantics=("parallel", "arbitrary"),
            vmem_limit_bytes=_VMEM_LIMIT),
        cost_estimate=pl.CostEstimate(
            flops=2 * n_p * n_p * hid_p + 2 * n_p * hid_p * out_p,
            transcendentals=n_p * hid_p,
            bytes_accessed=2 * n_p * n_p                       # bf16 A_hat
                           + 2 * n_row_tiles * n_p * hid_p     # bf16 hw re-reads
                           + 4 * (hid_p * out_p + hid_p + out_p
                                  + n_p * out_p)),
    )(kidx, kcnt, a_p, hw, bg, wf, bf)

    return out_padded[:N, :out_dim]


def build_gcn_adjacency(edge_index, num_nodes, *, pad_to=None,
                        out_dtype=jnp.float32):
    """Dense D^-1/2 (A + I) D^-1/2 (torch_geometric gcn_norm), built directly
    at its (optionally padded) final shape and dtype — padded rows/cols are
    exactly zero and never touched afterwards."""
    n_p = num_nodes if pad_to is None else pad_to
    src = edge_index[0]
    dst = edge_index[1]
    A = jnp.zeros((n_p, n_p), jnp.float32)
    A = A.at[dst, src].add(1.0)                   # node i sums messages j -> i
    node_ids = jnp.arange(num_nodes, dtype=jnp.int32)
    A = A.at[node_ids, node_ids].add(1.0)         # self loops (real nodes only)
    deg = A.sum(axis=1)
    dinv = jnp.where(deg > 0, jax.lax.rsqrt(deg), 0.0)
    return (A * dinv[:, None] * dinv[None, :]).astype(out_dtype)


def init_params(key, input_dim, hidden_dim, output_dim):
    ks = jax.random.split(key, 8)
    s = 0.1
    return {
        "w1": s * jax.random.normal(ks[0], (input_dim, hidden_dim), jnp.float32),
        "b1": s * jax.random.normal(ks[1], (1, hidden_dim), jnp.float32),
        "w2": s * jax.random.normal(ks[2], (hidden_dim, hidden_dim), jnp.float32),
        "b2": s * jax.random.normal(ks[3], (1, hidden_dim), jnp.float32),
        "wg": s * jax.random.normal(ks[4], (hidden_dim, hidden_dim), jnp.float32),
        "bg": s * jax.random.normal(ks[5], (1, hidden_dim), jnp.float32),
        "wf": s * jax.random.normal(ks[6], (hidden_dim, output_dim), jnp.float32),
        "bf": s * jax.random.normal(ks[7], (1, output_dim), jnp.float32),
    }


def reference_forward(x, a_hat, p):
    h = _elu(x @ p["w1"] + p["b1"])
    h = _elu(h @ p["w2"] + p["b2"])
    g = _elu(a_hat @ (h @ p["wg"]) + p["bg"])
    return g @ p["wf"] + p["bf"]


if __name__ == "__main__":
    key = jax.random.PRNGKey(0)
    N, input_dim, hidden_dim, output_dim = 8, 16, 32, 8

    k_x, k_p = jax.random.split(key)
    x = jax.random.normal(k_x, (N, input_dim), jnp.float32)

    # simple undirected ring graph (both directions, like a PyG edge_index)
    src = jnp.arange(N, dtype=jnp.int32)
    dst = (src + 1) % N
    edge_index = jnp.stack([jnp.concatenate([src, dst]),
                            jnp.concatenate([dst, src])], axis=0)

    params = init_params(k_p, input_dim, hidden_dim, output_dim)

    # Build A_hat once, directly at its padded bf16 streaming shape.
    n_p = padded_num_nodes(N)
    a_hat_stream = build_gcn_adjacency(edge_index, N, pad_to=n_p,
                                       out_dtype=jnp.bfloat16)

    out = separate_gnn_forward(x, a_hat_stream, params)
    out = jax.block_until_ready(out)

    # Full-precision reference (exact f32 adjacency, no padding).
    a_hat_f32 = build_gcn_adjacency(edge_index, N)
    ref = reference_forward(x, a_hat_f32, params)

    assert out.shape == (N, output_dim)
    # bf16 A_hat / hw streams (f32 accumulation) -> loosened tolerance.
    assert jnp.allclose(out, ref, atol=2e-2, rtol=2e-2), "mismatch vs reference"

    print("KERNEL_OK")
</pallas_src>

<mosaic_0001>
module attributes {stable_mosaic.version = 11 : i64} {
  func.func @mlp_kernel(%arg0: i32, %arg1: memref<512x128xf32, #tpu.memory_space<vmem>>, %arg2: memref<128x128xf32, #tpu.memory_space<vmem>>, %arg3: memref<1x128xf32, #tpu.memory_space<vmem>>, %arg4: memref<128x128xf32, #tpu.memory_space<vmem>>, %arg5: memref<1x128xf32, #tpu.memory_space<vmem>>, %arg6: memref<128x128xf32, #tpu.memory_space<vmem>>, %arg7: memref<512x128xbf16, #tpu.memory_space<vmem>>) attributes {dimension_semantics = [#tpu.dimension_semantics<parallel>], iteration_bounds = array<i64: 1>, scalar_prefetch = 0 : i64, scratch_operands = 0 : i64, tpu.core_type = #tpu.core_type<tc>, window_params = [{transform_indices = @transform_0, window_bounds = array<i64: 512, 128>}, {pipeline_mode = #tpu.pipeline_mode<synchronous>, transform_indices = @transform_1, window_bounds = array<i64: 128, 128>}, {pipeline_mode = #tpu.pipeline_mode<synchronous>, transform_indices = @transform_2, window_bounds = array<i64: 1, 128>}, {pipeline_mode = #tpu.pipeline_mode<synchronous>, transform_indices = @transform_3, window_bounds = array<i64: 128, 128>}, {pipeline_mode = #tpu.pipeline_mode<synchronous>, transform_indices = @transform_4, window_bounds = array<i64: 1, 128>}, {pipeline_mode = #tpu.pipeline_mode<synchronous>, transform_indices = @transform_5, window_bounds = array<i64: 128, 128>}, {transform_indices = @transform_6, window_bounds = array<i64: 512, 128>}]} {
    %c0 = arith.constant 0 : index
    %c0_0 = arith.constant 0 : index
    %0 = vector.load %arg1[%c0, %c0_0] : memref<512x128xf32, #tpu.memory_space<vmem>>, vector<512x128xf32>
    %c0_1 = arith.constant 0 : index
    %c0_2 = arith.constant 0 : index
    %1 = vector.load %arg2[%c0_1, %c0_2] : memref<128x128xf32, #tpu.memory_space<vmem>>, vector<128x128xf32>
    %cst = arith.constant dense<0.000000e+00> : vector<512x128xf32>
    %2 = tpu.matmul %0, %1, %cst {dimension_numbers = #tpu.dot_dimension_numbers<[1], [0], [0], [1], [0, 0, 1, 1], [], []>} : vector<512x128xf32>, vector<128x128xf32>, vector<512x128xf32> -> vector<512x128xf32>
    %c0_3 = arith.constant 0 : index
    %c0_4 = arith.constant 0 : index
    %3 = vector.load %arg3[%c0_3, %c0_4] : memref<1x128xf32, #tpu.memory_space<vmem>>, vector<1x128xf32>
    %4 = vector.broadcast %3 : vector<1x128xf32> to vector<512x128xf32>
    %5 = arith.addf %2, %4 : vector<512x128xf32>
    %cst_5 = arith.constant 0.000000e+00 : f32
    %6 = vector.broadcast %cst_5 : f32 to vector<512x128xf32>
    %7 = arith.cmpf ogt, %5, %6 : vector<512x128xf32>
    %cst_6 = arith.constant 0.000000e+00 : f32
    %8 = vector.broadcast %cst_6 : f32 to vector<512x128xf32>
    %9 = arith.minimumf %5, %8 : vector<512x128xf32>
    %10 = math.exp %9 : vector<512x128xf32>
    %cst_7 = arith.constant 1.000000e+00 : f32
    %11 = vector.broadcast %cst_7 : f32 to vector<512x128xf32>
    %12 = arith.subf %10, %11 : vector<512x128xf32>
    %13 = arith.select %7, %5, %12 : vector<512x128xi1>, vector<512x128xf32>
    %c0_8 = arith.constant 0 : index
    %c0_9 = arith.constant 0 : index
    %14 = vector.load %arg4[%c0_8, %c0_9] : memref<128x128xf32, #tpu.memory_space<vmem>>, vector<128x128xf32>
    %cst_10 = arith.constant dense<0.000000e+00> : vector<512x128xf32>
    %15 = tpu.matmul %13, %14, %cst_10 {dimension_numbers = #tpu.dot_dimension_numbers<[1], [0], [0], [1], [0, 0, 1, 1], [], []>} : vector<512x128xf32>, vector<128x128xf32>, vector<512x128xf32> -> vector<512x128xf32>
    %c0_11 = arith.constant 0 : index
    %c0_12 = arith.constant 0 : index
    %16 = vector.load %arg5[%c0_11, %c0_12] : memref<1x128xf32, #tpu.memory_space<vmem>>, vector<1x128xf32>
    %17 = vector.broadcast %16 : vector<1x128xf32> to vector<512x128xf32>
    %18 = arith.addf %15, %17 : vector<512x128xf32>
    %cst_13 = arith.constant 0.000000e+00 : f32
    %19 = vector.broadcast %cst_13 : f32 to vector<512x128xf32>
    %20 = arith.cmpf ogt, %18, %19 : vector<512x128xf32>
    %cst_14 = arith.constant 0.000000e+00 : f32
    %21 = vector.broadcast %cst_14 : f32 to vector<512x128xf32>
    %22 = arith.minimumf %18, %21 : vector<512x128xf32>
    %23 = math.exp %22 : vector<512x128xf32>
    %cst_15 = arith.constant 1.000000e+00 : f32
    %24 = vector.broadcast %cst_15 : f32 to vector<512x128xf32>
    %25 = arith.subf %23, %24 : vector<512x128xf32>
    %26 = arith.select %20, %18, %25 : vector<512x128xi1>, vector<512x128xf32>
    %c0_16 = arith.constant 0 : index
    %c0_17 = arith.constant 0 : index
    %27 = vector.load %arg6[%c0_16, %c0_17] : memref<128x128xf32, #tpu.memory_space<vmem>>, vector<128x128xf32>
    %cst_18 = arith.constant dense<0.000000e+00> : vector<512x128xf32>
    %28 = tpu.matmul %26, %27, %cst_18 {dimension_numbers = #tpu.dot_dimension_numbers<[1], [0], [0], [1], [0, 0, 1, 1], [], []>} : vector<512x128xf32>, vector<128x128xf32>, vector<512x128xf32> -> vector<512x128xf32>
    %29 = arith.truncf %28 : vector<512x128xf32> to vector<512x128xbf16>
    %c0_19 = arith.constant 0 : index
    %c0_20 = arith.constant 0 : index
    %30 = vector.load %arg7[%c0_19, %c0_20] : memref<512x128xbf16, #tpu.memory_space<vmem>>, vector<512x128xbf16>
    tpu.vector_store %arg7[%c0_19, %c0_20], %29 {strides = array<i32>} : memref<512x128xbf16, #tpu.memory_space<vmem>>, vector<512x128xbf16>,
    return
  }
  func.func @transform_0(%arg0: i32) -> (i32, i32) {
    %c0_i32 = arith.constant 0 : i32
    %c0_i32_0 = arith.constant 0 : i32
    return %arg0, %c0_i32 : i32, i32
  }
  func.func @transform_1(%arg0: i32) -> (i32, i32) {
    %c0_i32 = arith.constant 0 : i32
    %c0_i32_0 = arith.constant 0 : i32
    %c0_i32_1 = arith.constant 0 : i32
    return %c0_i32, %c0_i32_0 : i32, i32
  }
  func.func @transform_2(%arg0: i32) -> (i32, i32) {
    %c0_i32 = arith.constant 0 : i32
    %c0_i32_0 = arith.constant 0 : i32
    %c0_i32_1 = arith.constant 0 : i32
    return %c0_i32, %c0_i32_0 : i32, i32
  }
  func.func @transform_3(%arg0: i32) -> (i32, i32) {
    %c0_i32 = arith.constant 0 : i32
    %c0_i32_0 = arith.constant 0 : i32
    %c0_i32_1 = arith.constant 0 : i32
    return %c0_i32, %c0_i32_0 : i32, i32
  }
  func.func @transform_4(%arg0: i32) -> (i32, i32) {
    %c0_i32 = arith.constant 0 : i32
    %c0_i32_0 = arith.constant 0 : i32
    %c0_i32_1 = arith.constant 0 : i32
    return %c0_i32, %c0_i32_0 : i32, i32
  }
  func.func @transform_5(%arg0: i32) -> (i32, i32) {
    %c0_i32 = arith.constant 0 : i32
    %c0_i32_0 = arith.constant 0 : i32
    %c0_i32_1 = arith.constant 0 : i32
    return %c0_i32, %c0_i32_0 : i32, i32
  }
  func.func @transform_6(%arg0: i32) -> (i32, i32) {
    %c0_i32 = arith.constant 0 : i32
    %c0_i32_0 = arith.constant 0 : i32
    return %arg0, %c0_i32 : i32, i32
  }
}

</mosaic_0001>

<bundles_post_ra>
// kernel: tpu_custom_call.1
= control target key start
LH: loop header
LB: loop body
LE: loop exit
PB: predicated region body
PF: predicated region fallthrough
CT: control target
= control target key end

     0   :  { %11 = vsyncpa [#allocation3], 0  ;;  %s5125_s0 = inlined_call_operand.hbm [shape: f32[512,128], index: 0, kind: input, shape index: {}]   ;;  %s5126_s1 = inlined_call_operand.hbm [shape: f32[128,128], index: 1, kind: input, shape index: {}]   ;;  %s5127_s2 = inlined_call_operand.hbm [shape: f32[1,128], index: 2, kind: input, shape index: {}]   ;;  %s5128_s3 = inlined_call_operand.hbm [shape: f32[128,128], index: 3, kind: input, shape index: {}]   ;;  %s5129_s4 = inlined_call_operand.hbm [shape: f32[1,128], index: 4, kind: input, shape index: {}]   ;;  %s5130_s5 = inlined_call_operand.hbm [shape: f32[128,128], index: 5, kind: input, shape index: {}]   ;;  %s5131_s6 = inlined_call_operand.hbm [shape: bf16[512,128], index: 6, kind: output, shape index: {}]  }
   0x1   :  { %12 = vsyncpa [#allocation6], 0 }
   0x2   :  { %13 = vsyncpa [#allocation9], 0 }
   0x3   :  { %14 = vsyncpa [#allocation12], 0 }
   0x4   :  { %15 = vsyncpa [#allocation4], 0  ;;  %s4109_s21 = smov [#allocation5]   ;;  %s4110_s23 = smov [#allocation8]  }
   0x5   :  { %s33_s22 = sshll.u32 %s4109_s21, 4  ;;  %s55_s24 = sshll.u32 %s4110_s23, 4  ;;  %s34_s22 = int_to_ptr.vmem [resolvable:$true] %s33_s22  ;;  %s4155_s24 = int_to_ptr.vmem [resolvable:$true] %s55_s24 }
   0x6   :  { %s3945_s27 = scalar_lea.hbm %s5126_s1, 2048 }
   0x7   :  { %p3946_p0 = scmp.ne.s32.totalorder %s5126_s1, %s3945_s27  ;;  %p3949_p1 = scmp.lt.u32.totalorder %s3945_s27, %s5126_s1 }
   0x9   :  { %p3951_p2 = pnand %p3949_p1, %p3946_p0 }
   0xb   :  { %3954 = shalt.err (!%p3951_p2)
}
   0xc   :  { %s3955_s8 = scalar_lea.vmem %s34_s22, 2048  ;;  %p3960_p4 = scmp.lt.s32.totalorder %s34_s22, %s34_s22 }
   0xd   :  { %p3956_p3 = scmp.ne.s32.totalorder %s34_s22, %s3955_s8  ;;  %p3961_p5 = scmp.lt.s32.totalorder %s3955_s8, %s3955_s8 }
   0xf   :  { %p3962_p6 = por %p3961_p5, %p3960_p4 }
  0x11   :  { %p3963_p7 = pnand %p3962_p6, %p3956_p3 }
  0x13   :  { %3966 = shalt.err (!%p3963_p7)
}
  0x14   :  { %s4111_s9 = smov 128   ;;  %s4112_s10 = smov 8  }
  0x15   :  { %39 = dma.hbm_to_vmem [thread:$0]  %s5126_s1, 2048, %s34_s22, [#allocation6], %s4111_s9, %s4111_s9, %s4112_s10  }
  0x16   :  { %s3967_s15 = scalar_lea.hbm %s5128_s3, 2048 }
  0x17   :  { %p3968_p8 = scmp.ne.s32.totalorder %s5128_s3, %s3967_s15  ;;  %p3971_p9 = scmp.lt.u32.totalorder %s3967_s15, %s5128_s3 }
  0x19   :  { %p3973_p10 = pnand %p3971_p9, %p3968_p8 }
  0x1b   :  { %3976 = shalt.err (!%p3973_p10)
}
  0x1c   :  { %s3977_s20 = scalar_lea.vmem %s4155_s24, 2048  ;;  %p3982_p12 = scmp.lt.s32.totalorder %s4155_s24, %s4155_s24 }
  0x1d   :  { %p3978_p11 = scmp.ne.s32.totalorder %s4155_s24, %s3977_s20  ;;  %p3983_p13 = scmp.lt.s32.totalorder %s3977_s20, %s3977_s20 }
  0x1f   :  { %p3984_p0 = por %p3983_p13, %p3982_p12 }
  0x21   :  { %p3985_p1 = pnand %p3984_p0, %p3978_p11 }
  0x23   :  { %3988 = shalt.err (!%p3985_p1)
}
  0x24   :  { %61 = dma.hbm_to_vmem [thread:$0]  %s5128_s3, 2048, %s4155_s24, [#allocation9], %s4111_s9, %s4111_s9, %s4112_s10  }
  0x25   :  { %s4113_s22 = smov [#allocation2]   ;;  %s4114_s25 = smov [#allocation7]  }
  0x26   :  { %s21_s23 = sshll.u32 %s4113_s22, 4  ;;  %s46_s26 = sshll.u32 %s4114_s25, 4  ;;  %s22_s23 = int_to_ptr.vmem [resolvable:$true] %s21_s23  ;;  %s47_s26 = int_to_ptr.vmem [resolvable:$true] %s46_s26 }
  0x27   :  { %s3989_s29 = scalar_lea.hbm %s5125_s0, 8192 }
  0x28   :  { %p3990_p2 = scmp.ne.s32.totalorder %s5125_s0, %s3989_s29  ;;  %p3993_p3 = scmp.lt.u32.totalorder %s3989_s29, %s5125_s0 }
  0x2a   :  { %p3995_p4 = pnand %p3993_p3, %p3990_p2 }
  0x2c   :  { %3998 = shalt.err (!%p3995_p4)
}
  0x2d   :  { %s3999_s3 = scalar_lea.vmem %s22_s23, 8192  ;;  %p4004_p6 = scmp.lt.s32.totalorder %s22_s23, %s22_s23 }
  0x2e   :  { %p4000_p5 = scmp.ne.s32.totalorder %s22_s23, %s3999_s3  ;;  %p4005_p7 = scmp.lt.s32.totalorder %s3999_s3, %s3999_s3 }
  0x30   :  { %p4006_p8 = por %p4005_p7, %p4004_p6 }
  0x32   :  { %p4007_p9 = pnand %p4006_p8, %p4000_p5 }
  0x34   :  { %4010 = shalt.err (!%p4007_p9)
}
  0x35   :  { %27 = dma.hbm_to_vmem [thread:$0]  %s5125_s0, 8192, %s22_s23, [#allocation3], %s4111_s9, %s4111_s9, %s4112_s10  }
  0x36   :  { %s4011_s15 = scalar_lea.hbm %s5127_s2, 16 }
  0x37   :  { %p4012_p10 = scmp.ne.s32.totalorder %s5127_s2, %s4011_s15  ;;  %p4015_p11 = scmp.lt.u32.totalorder %s4011_s15, %s5127_s2 }
  0x39   :  { %p4017_p12 = pnand %p4015_p11, %p4012_p10 }
  0x3b   :  { %4020 = shalt.err (!%p4017_p12)
}
  0x3c   :  { %s4021_s20 = scalar_lea.vmem %s47_s26, 16  ;;  %s4025_s1 = scalar_lea.vmem %s47_s26, 32 }
  0x3d   :  { %p4022_p13 = scmp.ne.s32.totalorder %s47_s26, %s4021_s20  ;;  %p4026_p0 = scmp.lt.s32.totalorder %s47_s26, %s47_s26 }
  0x3e   :  { %p4027_p1 = scmp.lt.s32.totalorder %s4025_s1, %s4021_s20 }
  0x40   :  { %p4028_p2 = por %p4027_p1, %p4026_p0 }
  0x42   :  { %p4029_p3 = pnand %p4028_p2, %p4022_p13 }
  0x44   :  { %4032 = shalt.err (!%p4029_p3)
}
  0x45   :  { %49 = dma.hbm_to_vmem [thread:$0]  %s5127_s2, 16, %s47_s26, [#allocation6]  }
  0x46   :  { %s4115_s22 = smov [#allocation10]   ;;  %s4116_s25 = smov [#allocation11]  }
  0x47   :  { %s68_s23 = sshll.u32 %s4115_s22, 4  ;;  %s77_s27 = sshll.u32 %s4116_s25, 4  ;;  %s69_s23 = int_to_ptr.vmem [resolvable:$true] %s68_s23  ;;  %s4219_s27 = int_to_ptr.vmem [resolvable:$true] %s77_s27 }
  0x48   :  { %s4033_s30 = scalar_lea.hbm %s5129_s4, 16 }
  0x49   :  { %p4034_p4 = scmp.ne.s32.totalorder %s5129_s4, %s4033_s30  ;;  %p4037_p5 = scmp.lt.u32.totalorder %s4033_s30, %s5129_s4 }
  0x4b   :  { %p4039_p6 = pnand %p4037_p5, %p4034_p4 }
  0x4d   :  { %4042 = shalt.err (!%p4039_p6)
}
  0x4e   :  { %s4043_s2 = scalar_lea.vmem %s69_s23, 16  ;;  %s4047_s26 = scalar_lea.vmem %s69_s23, 32 }
  0x4f   :  { %p4044_p7 = scmp.ne.s32.totalorder %s69_s23, %s4043_s2  ;;  %p4048_p8 = scmp.lt.s32.totalorder %s69_s23, %s69_s23 }
  0x50   :  { %p4049_p9 = scmp.lt.s32.totalorder %s4047_s26, %s4043_s2 }
  0x52   :  { %p4050_p10 = por %p4049_p9, %p4048_p8 }
  0x54   :  { %p4051_p11 = pnand %p4050_p10, %p4044_p7 }
  0x56   :  { %4054 = shalt.err (!%p4051_p11)
}
  0x57   :  { %71 = dma.hbm_to_vmem [thread:$0]  %s5129_s4, 16, %s69_s23, [#allocation9]  }
  0x58   :  { %s4055_s15 = scalar_lea.hbm %s5130_s5, 2048 }
  0x59   :  { %p4056_p12 = scmp.ne.s32.totalorder %s5130_s5, %s4055_s15  ;;  %p4059_p13 = scmp.lt.u32.totalorder %s4055_s15, %s5130_s5 }
  0x5b   :  { %p4061_p0 = pnand %p4059_p13, %p4056_p12 }
  0x5d   :  { %4064 = shalt.err (!%p4061_p0)
}
  0x5e   :  { %s4065_s20 = scalar_lea.vmem %s4219_s27, 2048  ;;  %p4070_p2 = scmp.lt.s32.totalorder %s4219_s27, %s4219_s27 }
  0x5f   :  { %p4066_p1 = scmp.ne.s32.totalorder %s4219_s27, %s4065_s20  ;;  %p4071_p3 = scmp.lt.s32.totalorder %s4065_s20, %s4065_s20 }
  0x61   :  { %p4072_p4 = por %p4071_p3, %p4070_p2 }
  0x63   :  { %p4073_p5 = pnand %p4072_p4, %p4066_p1 }
  0x65   :  { %4076 = shalt.err (!%p4073_p5)
}
  0x66   :  { %83 = dma.hbm_to_vmem [thread:$0]  %s5130_s5, 2048, %s4219_s27, [#allocation12], %s4111_s9, %s4111_s9, %s4112_s10  }
  0x67   :  { %4099 = dma.done.wait [#allocation3], 8192  }
  0x68   :  { %4100 = vsyncadd [#allocation3], 4294959104 }
  0x69   :  { %4101 = dma.done.wait [#allocation6], 2064  }
  0x6a   :  { %4102 = vsyncadd [#allocation6], 4294965232 }
  0x6b   :  { %4103 = dma.done.wait [#allocation9], 2064  }
  0x6c   :  { %4104 = vsyncadd [#allocation9], 4294965232 }
  0x6d   :  { %4105 = dma.done.wait [#allocation12], 2048  }
  0x6e   :  { %4106 = vsyncadd [#allocation12], 4294965248  ;;  %v166_v0 = vld [vmem:[#allocation5] sm:$0xff]  ;;  %v167_v1 = vld [vmem:[#allocation5 + $0x8] sm:$0xff]  ;;  %s4117_s5 = smov [#allocation13]  }
  0x6f   :  { %v168_v2 = vld [vmem:[#allocation5 + $0x10] sm:$0xff]  ;;  %v3564_v3 = vpack.c.bf16 %v167_v1, %v166_v0  ;;  %v169_v4 = vld [vmem:[#allocation5 + $0x18] sm:$0xff]  ;;  %v170_v6 = vld [vmem:[#allocation5 + $0x20] sm:$0xff]  ;;  %s2476_s9 = sshll.u32 %s4117_s5, 4  ;;  %s2477_s9 = int_to_ptr.vmem [resolvable:$true] %s2476_s9 }
  0x70   :  { %v3568_v5 = vpack.c.bf16 %v169_v4, %v168_v2  ;;  %v171_v7 = vld [vmem:[#allocation5 + $0x28] sm:$0xff]  ;;  %v102_v9 = vld [vmem:[#allocation2] sm:$0xff]  ;;  %v172_v10 = vld [vmem:[#allocation5 + $0x30] sm:$0xff]  ;;  %s4077_s10 = scalar_lea.vmem %s2477_s9, 4096  ;;  %p4082_p7 = scmp.lt.s32.totalorder %s2477_s9, %s2477_s9 }
  0x71   :  { %3565 = vmatprep.subr.bf16.mxu0 %v3564_v3  ;;  %3660 = vmatprep.subr.bf16.mxu1 %v3564_v3  ;;  %v3572_v8 = vpack.c.bf16 %v171_v7, %v170_v6  ;;  %v173_v11 = vld [vmem:[#allocation5 + $0x38] sm:$0xff]  ;;  %v174_v13 = vld [vmem:[#allocation5 + $0x40] sm:$0xff]  ;;  %v175_v14 = vld [vmem:[#allocation5 + $0x48] sm:$0xff]  ;;  %p4078_p6 = scmp.ne.s32.totalorder %s2477_s9, %s4077_s10  ;;  %p4083_p8 = scmp.lt.s32.totalorder %s4077_s10, %s4077_s10 }
  0x72   :  { %3567 = vmatpush3.bf16.msra.mxu0 %v3564_v3  ;;  %3668 = vmatpush3.bf16.msra.mxu1 %v3564_v3  ;;  %v3576_v12 = vpack.c.bf16 %v173_v11, %v172_v10  ;;  %v3580_v15 = vpack.c.bf16 %v175_v14, %v174_v13  ;;  %v134_v16 = vld [vmem:[#allocation2 + $0x100] sm:$0xff]  ;;  %v176_v17 = vld [vmem:[#allocation5 + $0x50] sm:$0xff]  ;;  %v177_v18 = vld [vmem:[#allocation5 + $0x58] sm:$0xff] }
  0x73   :  { %3569 = vmatprep.subr.bf16.mxu0 %v3568_v5  ;;  %3661 = vmatprep.subr.bf16.mxu1 %v3568_v5  ;;  %v3584_v19 = vpack.c.bf16 %v177_v18, %v176_v17  ;;  %v178_v20 = vld [vmem:[#allocation5 + $0x60] sm:$0xff]  ;;  %v179_v21 = vld [vmem:[#allocation5 + $0x68] sm:$0xff]  ;;  %v180_v23 = vld [vmem:[#allocation5 + $0x70] sm:$0xff]  ;;  %p4084_p9 = por %p4083_p8, %p4082_p7 }
  0x74   :  { %3212 = vmatprep.mubr.f32.mxu0 %v102_v9  ;;  %3260 = vmatprep.mubr.f32.mxu1 %v134_v16  ;;  %v3588_v22 = vpack.c.bf16 %v179_v21, %v178_v20  ;;  %v181_v24 = vld [vmem:[#allocation5 + $0x78] sm:$0xff]  ;;  %v958_v26 = vld [vmem:[#allocation8] sm:$0xff]  ;;  %v959_v27 = vld [vmem:[#allocation8 + $0x8] sm:$0xff] }
  0x75   :  { %v3592_v25 = vpack.c.bf16 %v181_v24, %v180_v23  ;;  %v3596_v28 = vpack.c.bf16 %v959_v27, %v958_v26  ;;  %v960_v29 = vld [vmem:[#allocation8 + $0x10] sm:$0xff]  ;;  %v961_v30 = vld [vmem:[#allocation8 + $0x18] sm:$0xff]  ;;  %v103_v31 = vld [vmem:[#allocation2 + $0x8] sm:$0xff]  ;;  %p4085_p10 = pnand %p4084_p9, %p4078_p6 }
  0x76   :  { %3571 = vmatpush3.bf16.msra.mxu0 %v3568_v5  ;;  %3669 = vmatpush3.bf16.msra.mxu1 %v3568_v5  ;;  %v135_v32 = vld [vmem:[#allocation2 + $0x108] sm:$0xff]  ;;  %v104_v33 = vld [vmem:[#allocation2 + $0x10] sm:$0xff]  ;;  %v3600_v35 = vpack.c.bf16 %v961_v30, %v960_v29  ;;  %v105_v38 = vld [vmem:[#allocation2 + $0x18] sm:$0xff] }
  0x77   :  { %3573 = vmatprep.subr.bf16.mxu0 %v3572_v8  ;;  %3662 = vmatprep.subr.bf16.mxu1 %v3572_v8  ;;  %v136_v34 = vld [vmem:[#allocation2 + $0x110] sm:$0xff]  ;;  %v962_v36 = vld [vmem:[#allocation8 + $0x20] sm:$0xff]  ;;  %v137_v39 = vld [vmem:[#allocation2 + $0x118] sm:$0xff] }
  0x78   :  { %v963_v37 = vld [vmem:[#allocation8 + $0x28] sm:$0xff]  ;;  %v106_v40 = vld [vmem:[#allocation2 + $0x20] sm:$0xff]  ;;  %v964_v43 = vld [vmem:[#allocation8 + $0x30] sm:$0xff] }
  0x79   :  { %v138_v41 = vld [vmem:[#allocation2 + $0x120] sm:$0xff]  ;;  %v3604_v42 = vpack.c.bf16 %v963_v37, %v962_v36  ;;  %v107_v45 = vld [vmem:[#allocation2 + $0x28] sm:$0xff]  ;;  %v108_v47 = vld [vmem:[#allocation2 + $0x30] sm:$0xff] }
  0x7a   :  { %3575 = vmatpush3.bf16.msra.mxu0 %v3572_v8  ;;  %3670 = vmatpush3.bf16.msra.mxu1 %v3572_v8  ;;  %v965_v44 = vld [vmem:[#allocation8 + $0x38] sm:$0xff]  ;;  %v139_v46 = vld [vmem:[#allocation2 + $0x128] sm:$0xff]  ;;  %v140_v48 = vld [vmem:[#allocation2 + $0x130] sm:$0xff] }
  0x7b   :  { %3577 = vmatprep.subr.bf16.mxu0 %v3576_v12  ;;  %3663 = vmatprep.subr.bf16.mxu1 %v3576_v12  ;;  %v3608_v49 = vpack.c.bf16 %v965_v44, %v964_v43  ;;  %v966_v50 = vld [vmem:[#allocation8 + $0x40] sm:$0xff]  ;;  %v967_v51 = vld [vmem:[#allocation8 + $0x48] sm:$0xff]  ;;  %v109_v52 = vld [vmem:[#allocation2 + $0x38] sm:$0xff] }
  0x7c   :  { %v141_v53 = vld [vmem:[#allocation2 + $0x138] sm:$0xff]  ;;  %v110_v54 = vld [vmem:[#allocation2 + $0x40] sm:$0xff]  ;;  %v3612_v56 = vpack.c.bf16 %v967_v51, %v966_v50  ;;  %v111_v59 = vld [vmem:[#allocation2 + $0x48] sm:$0xff] }
  0x7d   :  { %v142_v55 = vld [vmem:[#allocation2 + $0x140] sm:$0xff]  ;;  %v968_v57 = vld [vmem:[#allocation8 + $0x50] sm:$0xff]  ;;  %v143_v60 = vld [vmem:[#allocation2 + $0x148] sm:$0xff] }
  0x7e   :  { %3579 = vmatpush3.bf16.msra.mxu0 %v3576_v12  ;;  %3671 = vmatpush3.bf16.msra.mxu1 %v3576_v12  ;;  %v969_v58 = vld [vmem:[#allocation8 + $0x58] sm:$0xff]  ;;  %v112_v61 = vld [vmem:[#allocation2 + $0x50] sm:$0xff]  ;;  %v115_v4 = vld [vmem:[#allocation2 + $0x68] sm:$0xff] }
  0x7f   :  { %3581 = vmatprep.subr.bf16.mxu0 %v3580_v15  ;;  %3664 = vmatprep.subr.bf16.mxu1 %v3580_v15  ;;  %v144_v62 = vld [vmem:[#allocation2 + $0x150] sm:$0xff]  ;;  %v3616_v63 = vpack.c.bf16 %v969_v58, %v968_v57  ;;  %v113_v0 = vld [vmem:[#allocation2 + $0x58] sm:$0xff]  ;;  %v114_v2 = vld [vmem:[#allocation2 + $0x60] sm:$0xff] }
  0x80   :  { %v145_v1 = vld [vmem:[#allocation2 + $0x158] sm:$0xff]  ;;  %v146_v3 = vld [vmem:[#allocation2 + $0x160] sm:$0xff]  ;;  %v147_v5 = vld [vmem:[#allocation2 + $0x168] sm:$0xff] }
  0x81   :  { %v116_v6 = vld [vmem:[#allocation2 + $0x70] sm:$0xff]  ;;  %v117_v8 = vld [vmem:[#allocation2 + $0x78] sm:$0xff]  ;;  %v118_v10 = vld [vmem:[#allocation2 + $0x80] sm:$0xff] }
  0x82   :  { %3583 = vmatpush3.bf16.msra.mxu0 %v3580_v15  ;;  %3672 = vmatpush3.bf16.msra.mxu1 %v3580_v15  ;;  %v148_v7 = vld [vmem:[#allocation2 + $0x170] sm:$0xff]  ;;  %v149_v9 = vld [vmem:[#allocation2 + $0x178] sm:$0xff]  ;;  %v150_v11 = vld [vmem:[#allocation2 + $0x180] sm:$0xff] }
  0x83   :  { %3585 = vmatprep.subr.bf16.mxu0 %v3584_v19  ;;  %3665 = vmatprep.subr.bf16.mxu1 %v3584_v19  ;;  %v119_v12 = vld [vmem:[#allocation2 + $0x88] sm:$0xff]  ;;  %v120_v14 = vld [vmem:[#allocation2 + $0x90] sm:$0xff]  ;;  %v121_v16 = vld [vmem:[#allocation2 + $0x98] sm:$0xff] }
  0x84   :  { %v151_v13 = vld [vmem:[#allocation2 + $0x188] sm:$0xff]  ;;  %v152_v15 = vld [vmem:[#allocation2 + $0x190] sm:$0xff]  ;;  %v153_v17 = vld [vmem:[#allocation2 + $0x198] sm:$0xff] }
  0x85   :  { %v122_v18 = vld [vmem:[#allocation2 + $0xa0] sm:$0xff]  ;;  %v123_v20 = vld [vmem:[#allocation2 + $0xa8] sm:$0xff]  ;;  %v156_v23 = vld [vmem:[#allocation2 + $0x1b0] sm:$0xff] }
  0x86   :  { %3587 = vmatpush3.bf16.msra.mxu0 %v3584_v19  ;;  %3673 = vmatpush3.bf16.msra.mxu1 %v3584_v19  ;;  %v154_v19 = vld [vmem:[#allocation2 + $0x1a0] sm:$0xff]  ;;  %v155_v21 = vld [vmem:[#allocation2 + $0x1a8] sm:$0xff]  ;;  %v125_v24 = vld [vmem:[#allocation2 + $0xb8] sm:$0xff] }
  0x87   :  { %3589 = vmatprep.subr.bf16.mxu0 %v3588_v22  ;;  %3666 = vmatprep.subr.bf16.mxu1 %v3588_v22  ;;  %v126_v26 = vld [vmem:[#allocation2 + $0xc0] sm:$0xff]  ;;  %v159_v29 = vld [vmem:[#allocation2 + $0x1c8] sm:$0xff]  ;;  %v128_v30 = vld [vmem:[#allocation2 + $0xd0] sm:$0xff] }
  0x88   :  { %v158_v27 = vld [vmem:[#allocation2 + $0x1c0] sm:$0xff]  ;;  %v131_v36 = vld [vmem:[#allocation2 + $0xe8] sm:$0xff] }
  0x89   :  { %v163_v37 = vld [vmem:[#allocation2 + $0x1e8] sm:$0xff] }
  0x8a   :  { %3591 = vmatpush3.bf16.msra.mxu0 %v3588_v22  ;;  %3674 = vmatpush3.bf16.msra.mxu1 %v3588_v22  ;;  %v124_v22 = vld [vmem:[#allocation2 + $0xb0] sm:$0xff] }
  0x8b   :  { %3593 = vmatprep.subr.bf16.mxu0 %v3592_v25  ;;  %3667 = vmatprep.subr.bf16.mxu1 %v3592_v25  ;;  %v971_v43 = vld [vmem:[#allocation8 + $0x68] sm:$0xff] }
  0x8e   :  { %3595 = vmatpush3.bf16.msra.mxu0 %v3592_v25  ;;  %3675 = vmatpush3.bf16.msra.mxu1 %v3592_v25  ;;  %v157_v25 = vld [vmem:[#allocation2 + $0x1b8] sm:$0xff] }
  0x8f   :  { %3597 = vmatprep.subr.bf16.mxu1 %v3596_v28 }
  0x91   :  { %3213 = vmatmul.mubr.f32.vlgmr.msra.gmra.mrb[0].mxu0 %v103_v31  ;;  %3261 = vmatmul.mubr.f32.vlgmr.msra.gmra.mrb[0].mxu1 %v135_v32  ;;  %v160_v31 = vld [vmem:[#allocation2 + $0x1d0] sm:$0xff]  ;;  %v129_v32 = vld [vmem:[#allocation2 + $0xd8] sm:$0xff] }
  0x92   :  { %3215 = vmatprep.mubr.f32.mxu0 %v104_v33  ;;  %3263 = vmatprep.mubr.f32.mxu1 %v136_v34  ;;  %v161_v33 = vld [vmem:[#allocation2 + $0x1d8] sm:$0xff]  ;;  %v130_v34 = vld [vmem:[#allocation2 + $0xe0] sm:$0xff] }
  0x93   :  { %3599 = vmatpush3.bf16.msra.mxu1 %v3596_v28  ;;  %v127_v28 = vld [vmem:[#allocation2 + $0xc8] sm:$0xff] }
  0x94   :  { %3601 = vmatprep.subr.bf16.mxu1 %v3600_v35 }
  0x95   :  { %3216 = vmatmul.mubr.f32.gmra.mrb[2].mxu0 %v105_v38  ;;  %3264 = vmatmul.mubr.f32.gmra.mrb[2].mxu1 %v137_v39  ;;  %v132_v38 = vld [vmem:[#allocation2 + $0xf0] sm:$0xff] }
  0x96   :  { %3218 = vmatprep.mubr.f32.mxu0 %v106_v40  ;;  %3266 = vmatprep.mubr.f32.mxu1 %v138_v41  ;;  %v164_v39 = vld [vmem:[#allocation2 + $0x1f0] sm:$0xff]  ;;  %v133_v40 = vld [vmem:[#allocation2 + $0xf8] sm:$0xff] }
  0x97   :  { %3603 = vmatpush3.bf16.msra.mxu1 %v3600_v35  ;;  %v162_v35 = vld [vmem:[#allocation2 + $0x1e0] sm:$0xff]  ;;  %v165_v41 = vld [vmem:[#allocation2 + $0x1f8] sm:$0xff] }
  0x98   :  { %3605 = vmatprep.subr.bf16.mxu1 %v3604_v42 }
  0x99   :  { %3219 = vmatmul.mubr.f32.gmra.mrb[4].mxu0 %v107_v45  ;;  %3267 = vmatmul.mubr.f32.gmra.mrb[4].mxu1 %v139_v46  ;;  %v972_v45 = vld [vmem:[#allocation8 + $0x70] sm:$0xff]  ;;  %v973_v46 = vld [vmem:[#allocation8 + $0x78] sm:$0xff] }
  0x9a   :  { %3221 = vmatprep.mubr.f32.mxu0 %v108_v47  ;;  %3269 = vmatprep.mubr.f32.mxu1 %v140_v48  ;;  %v3624_v47 = vpack.c.bf16 %v973_v46, %v972_v45  ;;  %v4253_v48 = vld [vmem:[#allocation7] ss:$0 sm:$0xff] }
  0x9b   :  { %3607 = vmatpush3.bf16.msra.mxu1 %v3604_v42  ;;  %v970_v42 = vld [vmem:[#allocation8 + $0x60] sm:$0xff] }
  0x9c   :  { %3609 = vmatprep.subr.bf16.mxu1 %v3608_v49  ;;  %v3620_v44 = vpack.c.bf16 %v971_v43, %v970_v42 }
  0x9d   :  { %3222 = vmatmul.mubr.f32.gmra.mrb[6].mxu0 %v109_v52  ;;  %3270 = vmatmul.mubr.f32.gmra.mrb[6].mxu1 %v141_v53 }
  0x9e   :  { %3224 = vmatprep.mubr.f32.mxu0 %v110_v54  ;;  %3272 = vmatprep.mubr.f32.mxu1 %v142_v55 }
  0x9f   :  { %3611 = vmatpush3.bf16.msra.mxu1 %v3608_v49 }
  0xa0   :  { %3613 = vmatprep.subr.bf16.mxu1 %v3612_v56 }
  0xa1   :  { %3225 = vmatmul.mubr.f32.gmra.mrb[8].mxu0 %v111_v59  ;;  %3273 = vmatmul.mubr.f32.gmra.mrb[8].mxu1 %v143_v60 }
  0xa2   :  { %3227 = vmatprep.mubr.f32.mxu0 %v112_v61  ;;  %3275 = vmatprep.mubr.f32.mxu1 %v144_v62 }
  0xa3   :  { %3615 = vmatpush3.bf16.msra.mxu1 %v3612_v56 }
  0xa4   :  { %3617 = vmatprep.subr.bf16.mxu1 %v3616_v63 }
  0xa5   :  { %3228 = vmatmul.mubr.f32.gmra.mrb[10].mxu0 %v113_v0  ;;  %3276 = vmatmul.mubr.f32.gmra.mrb[10].mxu1 %v145_v1 }
  0xa6   :  { %3230 = vmatprep.mubr.f32.mxu0 %v114_v2  ;;  %3278 = vmatprep.mubr.f32.mxu1 %v146_v3 }
  0xa7   :  { %3619 = vmatpush3.bf16.msra.mxu1 %v3616_v63 }
  0xa8   :  { %3621 = vmatprep.subr.bf16.mxu1 %v3620_v44 }
  0xa9   :  { %3231 = vmatmul.mubr.f32.gmra.mrb[12].mxu0 %v115_v4  ;;  %3279 = vmatmul.mubr.f32.gmra.mrb[12].mxu1 %v147_v5 }
  0xaa   :  { %3233 = vmatprep.mubr.f32.mxu0 %v116_v6  ;;  %3281 = vmatprep.mubr.f32.mxu1 %v148_v7 }
  0xab   :  { %3623 = vmatpush3.bf16.msra.mxu1 %v3620_v44 }
  0xac   :  { %3625 = vmatprep.subr.bf16.mxu1 %v3624_v47 }
  0xad   :  { %3234 = vmatmul.mubr.f32.gmra.mrb[14].mxu0 %v117_v8  ;;  %3282 = vmatmul.mubr.f32.gmra.mrb[14].mxu1 %v149_v9 }
  0xae   :  { %3236 = vmatprep.mubr.f32.mxu0 %v118_v10  ;;  %3284 = vmatprep.mubr.f32.mxu1 %v150_v11 }
  0xaf   :  { %3627 = vmatpush3.bf16.msra.mxu1 %v3624_v47 }
  0xb1   :  { %3237 = vmatmul.mubr.f32.gmra.mrb[16].mxu0 %v119_v12  ;;  %3285 = vmatmul.mubr.f32.gmra.mrb[16].mxu1 %v151_v13 }
  0xb2   :  { %3239 = vmatprep.mubr.f32.mxu0 %v120_v14  ;;  %3287 = vmatprep.mubr.f32.mxu1 %v152_v15 }
  0xb5   :  { %3240 = vmatmul.mubr.f32.gmra.mrb[18].mxu0 %v121_v16  ;;  %3288 = vmatmul.mubr.f32.gmra.mrb[18].mxu1 %v153_v17 }
  0xb6   :  { %3242 = vmatprep.mubr.f32.mxu0 %v122_v18  ;;  %3290 = vmatprep.mubr.f32.mxu1 %v154_v19 }
  0xb9   :  { %3243 = vmatmul.mubr.f32.gmra.mrb[20].mxu0 %v123_v20  ;;  %3291 = vmatmul.mubr.f32.gmra.mrb[20].mxu1 %v155_v21 }
  0xba   :  { %3245 = vmatprep.mubr.f32.mxu0 %v124_v22  ;;  %3293 = vmatprep.mubr.f32.mxu1 %v156_v23 }
  0xbd   :  { %3246 = vmatmul.mubr.f32.gmra.mrb[22].mxu0 %v125_v24  ;;  %3294 = vmatmul.mubr.f32.gmra.mrb[22].mxu1 %v157_v25 }
  0xbe   :  { %3248 = vmatprep.mubr.f32.mxu0 %v126_v26  ;;  %3296 = vmatprep.mubr.f32.mxu1 %v158_v27 }
  0xc1   :  { %3249 = vmatmul.mubr.f32.gmra.mrb[24].mxu0 %v127_v28  ;;  %3297 = vmatmul.mubr.f32.gmra.mrb[24].mxu1 %v159_v29 }
  0xc2   :  { %3251 = vmatprep.mubr.f32.mxu0 %v128_v30  ;;  %3299 = vmatprep.mubr.f32.mxu1 %v160_v31 }
  0xc5   :  { %3252 = vmatmul.mubr.f32.gmra.mrb[26].mxu0 %v129_v32  ;;  %3300 = vmatmul.mubr.f32.gmra.mrb[26].mxu1 %v161_v33 }
  0xc6   :  { %3254 = vmatprep.mubr.f32.mxu0 %v130_v34  ;;  %3302 = vmatprep.mubr.f32.mxu1 %v162_v35 }
  0xc9   :  { %3255 = vmatmul.mubr.f32.gmra.mrb[28].mxu0 %v131_v36  ;;  %3303 = vmatmul.mubr.f32.gmra.mrb[28].mxu1 %v163_v37 }
  0xca   :  { %3257 = vmatprep.mubr.f32.mxu0 %v132_v38  ;;  %3305 = vmatprep.mubr.f32.mxu1 %v164_v39 }
  0xcd   :  { %3258 = vmatmul.mubr.f32.gmra.mrb[30].mxu0 %v133_v40  ;;  %3306 = vmatmul.mubr.f32.gmra.mrb[30].mxu1 %v165_v41 }
 0x164   :  { %v3214_v49 = vpop.f32.mrb[0].mxu0  ;;  %v3262_v50 = vpop.f32.mrb[0].mxu1 }
 0x165   :  { %v4256_v51 = vadd.f32 %v3214_v49, %v4253_v48  ;;  %v255_v52 = vpop.f32.mrb[1].mxu0  ;;  %v415_v53 = vpop.f32.mrb[1].mxu1  ;;  %v4281_v8 = vadd.f32 %v3262_v50, %v4253_v48 }
 0x166   :  { %v4259_v54 = vadd.f32 %v4253_v48, %v255_v52  ;;  %v4291_v15 = vadd.f32 %v4253_v48, %v415_v53 }
 0x167   :  { %v639_v55 = vmin.f32 %v4256_v51, 0.0  ;;  %v671_v20 = vmin.f32 %v4281_v8, 0.0  ;;  %vm575_vm0 = vcmp.gt.f32.partialorder %v4256_v51, 0.0 }
 0x168   :  { %v638_v56 = vmin.f32 %v4259_v54, 0.0  ;;  %v3217_v57 = vpop.f32.mrb[2].mxu0  ;;  %v4263_v58 = vpop.f32.mrb[2].mxu1  ;;  %v670_v27 = vmin.f32 %v4291_v15, 0.0  ;;  %vm574_vm1 = vcmp.gt.f32.partialorder %v4259_v54, 0.0 }
 0x169   :  { %v704_v59 = vmul.f32 1.442695, %v639_v55  ;;  %v4266_v60 = vadd.f32 %v3217_v57, %v4253_v48  ;;  %v265_v61 = vpop.f32.mrb[3].mxu0  ;;  %v4268_v62 = vpop.f32.mrb[3].mxu1  ;;  %v768_v33 = vmul.f32 1.442695, %v671_v20 }
 0x16a   :  { %v702_v63 = vmul.f32 1.442695, %v638_v56  ;;  %v4271_v0 = vadd.f32 %v4253_v48, %v265_v61  ;;  %v766_v43 = vmul.f32 1.442695, %v670_v27 }
 0x16b   :  { %3687 = vpow2.f32 %v704_v59  ;;  %v641_v1 = vmin.f32 %v4266_v60, 0.0  ;;  %vm577_vm3 = vcmp.gt.f32.partialorder %v4266_v60, 0.0 }
 0x16c   :  { %3689 = vpow2.f32 %v702_v63  ;;  %v640_v2 = vmin.f32 %v4271_v0, 0.0  ;;  %v3220_v3 = vpop.f32.mrb[4].mxu0  ;;  %v4275_v4 = vpop.f32.mrb[4].mxu1  ;;  %vm576_vm2 = vcmp.gt.f32.partialorder %v4271_v0, 0.0 }
 0x16d   :  { %v708_v5 = vmul.f32 1.442695, %v641_v1  ;;  %v4278_v6 = vadd.f32 %v3220_v3, %v4253_v48  ;;  %v275_v7 = vpop.f32.mrb[5].mxu0  ;;  %v4283_v9 = vpop.f32.mrb[5].mxu1 }
 0x16e   :  { %v706_v10 = vmul.f32 1.442695, %v640_v2  ;;  %v4286_v11 = vadd.f32 %v4253_v48, %v275_v7 }
 0x16f   :  { %3691 = vpow2.f32 %v708_v5  ;;  %v643_v12 = vmin.f32 %v4278_v6, 0.0  ;;  %vm579_vm5 = vcmp.gt.f32.partialorder %v4278_v6, 0.0 }
 0x170   :  { %3693 = vpow2.f32 %v706_v10  ;;  %v642_v13 = vmin.f32 %v4286_v11, 0.0  ;;  %v3223_v14 = vpop.f32.mrb[6].mxu0  ;;  %v4293_v16 = vpop.f32.mrb[6].mxu1  ;;  %vm578_vm4 = vcmp.gt.f32.partialorder %v4286_v11, 0.0 }
 0x171   :  { %v712_v17 = vmul.f32 1.442695, %v643_v12  ;;  %v4296_v18 = vadd.f32 %v3223_v14, %v4253_v48  ;;  %v285_v19 = vpop.f32.mrb[7].mxu0  ;;  %v4299_v21 = vpop.f32.mrb[7].mxu1 }
 0x172   :  { %v710_v22 = vmul.f32 1.442695, %v642_v13  ;;  %v4302_v23 = vadd.f32 %v4253_v48, %v285_v19 }
 0x173   :  { %3695 = vpow2.f32 %v712_v17  ;;  %v645_v24 = vmin.f32 %v4296_v18, 0.0  ;;  %vm581_vm7 = vcmp.gt.f32.partialorder %v4296_v18, 0.0 }
 0x174   :  { %3697 = vpow2.f32 %v710_v22  ;;  %v644_v25 = vmin.f32 %v4302_v23, 0.0  ;;  %v3226_v26 = vpop.f32.mrb[8].mxu0  ;;  %v4307_v28 = vpop.f32.mrb[8].mxu1  ;;  %vm580_vm6 = vcmp.gt.f32.partialorder %v4302_v23, 0.0 }
 0x175   :  { %v3688_v29 = vpop.eup %3687  ;;  %v716_v30 = vmul.f32 1.442695, %v645_v24  ;;  %v4310_v31 = vadd.f32 %v3226_v26, %v4253_v48  ;;  %v295_v32 = vpop.f32.mrb[9].mxu0 }
 0x176   :  { %v4312_v34 = vpop.f32.mrb[9].mxu1  ;;  %v3690_v35 = vpop.eup %3689  ;;  %v2493_v36 = vadd.f32 -1.0, %v3688_v29  ;;  %v714_v37 = vmul.f32 1.442695, %v644_v25  ;;  %v4315_v38 = vadd.f32 %v4253_v48, %v295_v32 }
 0x177   :  { %3699 = vpow2.f32 %v716_v30  ;;  %v647_v39 = vmin.f32 %v4310_v31, 0.0  ;;  %v2492_v40 = vadd.f32 -1.0, %v3690_v35  ;;  %vm583_vm9 = vcmp.gt.f32.partialorder %v4310_v31, 0.0 }
 0x178   :  { %3701 = vpow2.f32 %v714_v37  ;;  %v646_v41 = vmin.f32 %v4315_v38, 0.0  ;;  %v3229_v42 = vpop.f32.mrb[10].mxu0  ;;  %v4321_v44 = vpop.f32.mrb[10].mxu1  ;;  %v895_v55 = vsel %vm575_vm0, %v4256_v51, %v2493_v36  ;;  %vm582_vm8 = vcmp.gt.f32.partialorder %v4315_v38, 0.0 }
 0x179   :  { %v3692_v45 = vpop.eup %3691  ;;  %v720_v46 = vmul.f32 1.442695, %v647_v39  ;;  %v4324_v47 = vadd.f32 %v3229_v42, %v4253_v48  ;;  %v305_v49 = vpop.f32.mrb[11].mxu0  ;;  %v894_v50 = vsel %vm574_vm1, %v4259_v54, %v2492_v40  ;;  %3703 = vpow2.f32 %v768_v33 }
 0x17a   :  { %v4327_v52 = vpop.f32.mrb[11].mxu1  ;;  %v3694_v53 = vpop.eup %3693  ;;  %v718_v56 = vmul.f32 1.442695, %v646_v41  ;;  %v4333_v57 = vadd.f32 %v4253_v48, %v305_v49  ;;  %3340 = vmatprep.mubr.f32.mxu1 %v894_v50  ;;  %v2495_v59 = vadd.f32 -1.0, %v3692_v45 }
 0x17b   :  { %3705 = vpow2.f32 %v720_v46  ;;  %v649_v61 = vmin.f32 %v4324_v47, 0.0  ;;  %3341 = vmatmul.mubr.f32.vlgmr.msra.gmra.mrb[32].mxu1 %v895_v55  ;;  %v2494_v63 = vadd.f32 -1.0, %v3694_v53  ;;  %vm585_vm11 = vcmp.gt.f32.partialorder %v4324_v47, 0.0 }
 0x17c   :  { %3707 = vpow2.f32 %v718_v56  ;;  %v648_v54 = vmin.f32 %v4333_v57, 0.0  ;;  %v3232_v1 = vpop.f32.mrb[12].mxu0  ;;  %v4339_v51 = vpop.f32.mrb[12].mxu1  ;;  %v897_v19 = vsel %vm577_vm3, %v4266_v60, %v2495_v59  ;;  %vm584_vm10 = vcmp.gt.f32.partialorder %v4333_v57, 0.0 }
 0x17d   :  { %v3696_v2 = vpop.eup %3695  ;;  %v724_v3 = vmul.f32 1.442695, %v649_v61  ;;  %v4342_v5 = vadd.f32 %v3232_v1, %v4253_v48  ;;  %v315_v7 = vpop.f32.mrb[13].mxu0  ;;  %v896_v10 = vsel %vm576_vm2, %v4271_v0, %v2494_v63  ;;  %3709 = vpow2.f32 %v766_v43 }
 0x17e   :  { %v4345_v12 = vpop.f32.mrb[13].mxu1  ;;  %v3698_v13 = vpop.eup %3697  ;;  %v722_v14 = vmul.f32 1.442695, %v648_v54  ;;  %v4348_v17 = vadd.f32 %v4253_v48, %v315_v7  ;;  %3343 = vmatprep.mubr.f32.mxu1 %v896_v10  ;;  %v2497_v20 = vadd.f32 -1.0, %v3696_v2 }
 0x17f   :  { %3711 = vpow2.f32 %v724_v3  ;;  %v651_v22 = vmin.f32 %v4342_v5, 0.0  ;;  %3344 = vmatmul.mubr.f32.gmra.mrb[34].mxu1 %v897_v19  ;;  %v2496_v24 = vadd.f32 -1.0, %v3698_v13  ;;  %vm587_vm13 = vcmp.gt.f32.partialorder %v4342_v5, 0.0 }
 0x180   :  { %3713 = vpow2.f32 %v722_v14  ;;  %v650_v0 = vmin.f32 %v4348_v17, 0.0  ;;  %v3235_v25 = vpop.f32.mrb[14].mxu0  ;;  %v4354_v26 = vpop.f32.mrb[14].mxu1  ;;  %v899_v39 = vsel %vm579_vm5, %v4278_v6, %v2497_v20  ;;  %vm586_vm12 = vcmp.gt.f32.partialorder %v4348_v17, 0.0 }
 0x181   :  { %v3700_v27 = vpop.eup %3699  ;;  %v728_v29 = vmul.f32 1.442695, %v651_v22  ;;  %v4357_v30 = vadd.f32 %v3235_v25, %v4253_v48  ;;  %v325_v60 = vpop.f32.mrb[15].mxu0  ;;  %v898_v32 = vsel %vm578_vm4, %v4286_v11, %v2496_v24 }
 0x182   :  { %v4361_v33 = vpop.f32.mrb[15].mxu1  ;;  %v3702_v35 = vpop.eup %3701  ;;  %v726_v36 = vmul.f32 1.442695, %v650_v0  ;;  %v4364_v37 = vadd.f32 %v4253_v48, %v325_v60  ;;  %3346 = vmatprep.mubr.f32.mxu1 %v898_v32  ;;  %v2499_v40 = vadd.f32 -1.0, %v3700_v27 }
 0x183   :  { %v4367_v41 = vpop.eup %3703  ;;  %3715 = vpow2.f32 %v728_v29  ;;  %v653_v42 = vmin.f32 %v4357_v30, 0.0  ;;  %3347 = vmatmul.mubr.f32.gmra.mrb[36].mxu1 %v899_v39  ;;  %v2498_v11 = vadd.f32 -1.0, %v3702_v35  ;;  %vm589_vm15 = vcmp.gt.f32.partialorder %v4357_v30, 0.0 }
 0x184   :  { %3717 = vpow2.f32 %v726_v36  ;;  %v652_v43 = vmin.f32 %v4364_v37, 0.0  ;;  %v3238_v45 = vpop.f32.mrb[16].mxu0  ;;  %v4372_v46 = vpop.f32.mrb[16].mxu1  ;;  %v901_v54 = vsel %vm581_vm7, %v4296_v18, %v2499_v40  ;;  %vm588_vm14 = vcmp.gt.f32.partialorder %v4364_v37, 0.0 }
 0x185   :  { %v3706_v49 = vpop.eup %3705  ;;  %v732_v50 = vmul.f32 1.442695, %v653_v42  ;;  %v4375_v6 = vadd.f32 %v3238_v45, %v4253_v48  ;;  %v335_v53 = vpop.f32.mrb[17].mxu0  ;;  %v900_v55 = vsel %vm580_vm6, %v4302_v23, %v2498_v11 }
 0x186   :  { %v4379_v56 = vpop.f32.mrb[17].mxu1  ;;  %v3708_v59 = vpop.eup %3707  ;;  %v730_v61 = vmul.f32 1.442695, %v652_v43  ;;  %v4382_v63 = vadd.f32 %v4253_v48, %v335_v53  ;;  %3349 = vmatprep.mubr.f32.mxu1 %v900_v55  ;;  %v2501_v1 = vadd.f32 -1.0, %v3706_v49 }
 0x187   :  { %v4385_v2 = vpop.eup %3709  ;;  %3719 = vpow2.f32 %v732_v50  ;;  %v655_v3 = vmin.f32 %v4375_v6, 0.0  ;;  %3350 = vmatmul.mubr.f32.gmra.mrb[38].mxu1 %v901_v54  ;;  %v2500_v23 = vadd.f32 -1.0, %v3708_v59  ;;  %vm591_vm1 = vcmp.gt.f32.partialorder %v4375_v6, 0.0 }
 0x188   :  { %3721 = vpow2.f32 %v730_v61  ;;  %v654_v7 = vmin.f32 %v4382_v63, 0.0  ;;  %v3241_v10 = vpop.f32.mrb[18].mxu0  ;;  %v4390_v13 = vpop.f32.mrb[18].mxu1  ;;  %v903_v29 = vsel %vm583_vm9, %v4310_v31, %v2501_v1  ;;  %vm590_vm0 = vcmp.gt.f32.partialorder %v4382_v63, 0.0 }
 0x189   :  { %v3712_v14 = vpop.eup %3711  ;;  %v736_v19 = vmul.f32 1.442695, %v655_v3  ;;  %v4393_v18 = vadd.f32 %v3241_v10, %v4253_v48  ;;  %v345_v20 = vpop.f32.mrb[19].mxu0  ;;  %v902_v22 = vsel %vm582_vm8, %v4315_v38, %v2500_v23 }
 0x18a   :  { %v4397_v24 = vpop.f32.mrb[19].mxu1  ;;  %v3714_v0 = vpop.eup %3713  ;;  %v734_v25 = vmul.f32 1.442695, %v654_v7  ;;  %v4400_v27 = vadd.f32 %v4253_v48, %v345_v20  ;;  %3352 = vmatprep.mubr.f32.mxu1 %v902_v22  ;;  %v2503_v60 = vadd.f32 -1.0, %v3712_v14 }
 0x18b   :  { %3723 = vpow2.f32 %v736_v19  ;;  %v657_v32 = vmin.f32 %v4393_v18, 0.0  ;;  %3353 = vmatmul.mubr.f32.gmra.mrb[40].mxu1 %v903_v29  ;;  %v2502_v35 = vadd.f32 -1.0, %v3714_v0  ;;  %vm593_vm3 = vcmp.gt.f32.partialorder %v4393_v18, 0.0 }
 0x18c   :  { %3725 = vpow2.f32 %v734_v25  ;;  %v656_v38 = vmin.f32 %v4400_v27, 0.0  ;;  %v3244_v36 = vpop.f32.mrb[20].mxu0  ;;  %v4406_v39 = vpop.f32.mrb[20].mxu1  ;;  %v905_v55 = vsel %vm585_vm11, %v4324_v47, %v2503_v60  ;;  %vm592_vm2 = vcmp.gt.f32.partialorder %v4400_v27, 0.0 }
 0x18d   :  { %v3716_v40 = vpop.eup %3715  ;;  %v740_v42 = vmul.f32 1.442695, %v657_v32  ;;  %v4409_v11 = vadd.f32 %v3244_v36, %v4253_v48  ;;  %v355_v31 = vpop.f32.mrb[21].mxu0  ;;  %v904_v43 = vsel %vm584_vm10, %v4333_v57, %v2502_v35 }
 0x18e   :  { %v4413_v45 = vpop.f32.mrb[21].mxu1  ;;  %v3718_v49 = vpop.eup %3717  ;;  %v738_v50 = vmul.f32 1.442695, %v656_v38  ;;  %v4416_v53 = vadd.f32 %v4253_v48, %v355_v31  ;;  %3355 = vmatprep.mubr.f32.mxu1 %v904_v43  ;;  %v2505_v59 = vadd.f32 -1.0, %v3716_v40 }
 0x18f   :  { %3727 = vpow2.f32 %v740_v42  ;;  %v659_v61 = vmin.f32 %v4409_v11, 0.0  ;;  %3356 = vmatmul.mubr.f32.gmra.mrb[42].mxu1 %v905_v55  ;;  %v2504_v54 = vadd.f32 -1.0, %v3718_v49  ;;  %vm595_vm5 = vcmp.gt.f32.partialorder %v4409_v11, 0.0 }
 0x190   :  { %3729 = vpow2.f32 %v738_v50  ;;  %v658_v57 = vmin.f32 %v4416_v53, 0.0  ;;  %v3247_v1 = vpop.f32.mrb[22].mxu0  ;;  %v4422_v3 = vpop.f32.mrb[22].mxu1  ;;  %v907_v25 = vsel %vm587_vm13, %v4342_v5, %v2505_v59  ;;  %vm594_vm4 = vcmp.gt.f32.partialorder %v4416_v53, 0.0 }
 0x191   :  { %v3720_v23 = vpop.eup %3719  ;;  %v744_v7 = vmul.f32 1.442695, %v659_v61  ;;  %v4425_v10 = vadd.f32 %v3247_v1, %v4253_v48  ;;  %v365_v47 = vpop.f32.mrb[23].mxu0  ;;  %v906_v14 = vsel %vm586_vm12, %v4348_v17, %v2504_v54  ;;  %v4455_v1 = vadd.f32 %v4263_v58, %v4253_v48 }
 0x192   :  { %v4429_v19 = vpop.f32.mrb[23].mxu1  ;;  %v3722_v20 = vpop.eup %3721  ;;  %v742_v22 = vmul.f32 1.442695, %v658_v57  ;;  %v4432_v0 = vadd.f32 %v4253_v48, %v365_v47  ;;  %3358 = vmatprep.mubr.f32.mxu1 %v906_v14  ;;  %v2507_v29 = vadd.f32 -1.0, %v3720_v23 }
 0x193   :  { %3731 = vpow2.f32 %v744_v7  ;;  %v661_v60 = vmin.f32 %v4425_v10, 0.0  ;;  %3359 = vmatmul.mubr.f32.gmra.mrb[44].mxu1 %v907_v25  ;;  %v2506_v32 = vadd.f32 -1.0, %v3722_v20  ;;  %vm597_vm7 = vcmp.gt.f32.partialorder %v4425_v10, 0.0 }
 0x194   :  { %3733 = vpow2.f32 %v742_v22  ;;  %v660_v17 = vmin.f32 %v4432_v0, 0.0  ;;  %v3250_v35 = vpop.f32.mrb[24].mxu0  ;;  %v4438_v38 = vpop.f32.mrb[24].mxu1  ;;  %v909_v59 = vsel %vm589_vm15, %v4357_v30, %v2507_v29  ;;  %vm596_vm6 = vcmp.gt.f32.partialorder %v4432_v0, 0.0 }
 0x195   :  { %v3724_v36 = vpop.eup %3723  ;;  %v748_v40 = vmul.f32 1.442695, %v661_v60  ;;  %v4441_v42 = vadd.f32 %v3250_v35, %v4253_v48  ;;  %v375_v5 = vpop.f32.mrb[25].mxu0  ;;  %v908_v31 = vsel %vm588_vm14, %v4364_v37, %v2506_v32  ;;  %v4473_v35 = vadd.f32 %v4253_v48, %v4268_v62 }
 0x196   :  { %v4445_v43 = vpop.f32.mrb[25].mxu1  ;;  %v3726_v49 = vpop.eup %3725  ;;  %v746_v50 = vmul.f32 1.442695, %v660_v17  ;;  %v4448_v55 = vadd.f32 %v4253_v48, %v375_v5  ;;  %3361 = vmatprep.mubr.f32.mxu1 %v908_v31  ;;  %v2509_v61 = vadd.f32 -1.0, %v3724_v36  ;;  %vm606_vm14 = vcmp.gt.f32.partialorder %v4291_v15, 0.0 }
 0x197   :  { %3735 = vpow2.f32 %v748_v40  ;;  %v663_v54 = vmin.f32 %v4441_v42, 0.0  ;;  %3362 = vmatmul.mubr.f32.gmra.mrb[46].mxu1 %v909_v59  ;;  %v2508_v57 = vadd.f32 -1.0, %v3726_v49  ;;  %v673_v40 = vmin.f32 %v4455_v1, 0.0 }
 0x198   :  { %3737 = vpow2.f32 %v746_v50  ;;  %v662_v37 = vmin.f32 %v4448_v55, 0.0  ;;  %v3253_v23 = vpop.f32.mrb[26].mxu0  ;;  %v4458_v7 = vpop.f32.mrb[26].mxu1  ;;  %v911_v32 = vsel %vm591_vm1, %v4375_v6, %v2509_v61  ;;  %vm598_vm8 = vcmp.gt.f32.partialorder %v4448_v55, 0.0 }
 0x199   :  { %v3728_v47 = vpop.eup %3727  ;;  %v752_v30 = vmul.f32 1.442695, %v663_v54  ;;  %v4461_v14 = vadd.f32 %v3253_v23, %v4253_v48  ;;  %v385_v20 = vpop.f32.mrb[27].mxu0  ;;  %v910_v22 = vsel %vm590_vm0, %v4382_v63, %v2508_v57  ;;  %vm599_vm9 = vcmp.gt.f32.partialorder %v4441_v42, 0.0 }
 0x19a   :  { %v4465_v25 = vpop.f32.mrb[27].mxu1  ;;  %v3730_v29 = vpop.eup %3729  ;;  %v750_v58 = vmul.f32 1.442695, %v662_v37  ;;  %v4468_v60 = vadd.f32 %v4253_v48, %v385_v20  ;;  %3364 = vmatprep.mubr.f32.mxu1 %v910_v22  ;;  %v2511_v17 = vadd.f32 -1.0, %v3728_v47  ;;  %v672_v20 = vmin.f32 %v4473_v35, 0.0 }
 0x19b   :  { %3739 = vpow2.f32 %v752_v30  ;;  %v665_v63 = vmin.f32 %v4461_v14, 0.0  ;;  %3365 = vmatmul.mubr.f32.gmra.mrb[48].mxu1 %v911_v32  ;;  %v2510_v36 = vadd.f32 -1.0, %v3730_v29  ;;  %v4496_v29 = vadd.f32 %v4253_v48, %v4283_v9 }
 0x19c   :  { %3741 = vpow2.f32 %v750_v58  ;;  %v664_v5 = vmin.f32 %v4468_v60, 0.0  ;;  %v3256_v31 = vpop.f32.mrb[28].mxu0  ;;  %v4479_v49 = vpop.f32.mrb[28].mxu1  ;;  %v913_v47 = vsel %vm593_vm3, %v4393_v18, %v2511_v17  ;;  %vm600_vm10 = vcmp.gt.f32.partialorder %v4468_v60, 0.0 }
 0x19d   :  { %v3732_v6 = vpop.eup %3731  ;;  %v756_v50 = vmul.f32 1.442695, %v665_v63  ;;  %v4482_v59 = vadd.f32 %v3256_v31, %v4253_v48  ;;  %v395_v62 = vpop.f32.mrb[29].mxu0  ;;  %v912_v61 = vsel %vm592_vm2, %v4400_v27, %v2510_v36  ;;  %vm601_vm11 = vcmp.gt.f32.partialorder %v4461_v14, 0.0 }
 0x19e   :  { %v4486_v54 = vpop.f32.mrb[29].mxu1  ;;  %v3734_v57 = vpop.eup %3733  ;;  %v754_v37 = vmul.f32 1.442695, %v664_v5  ;;  %v4489_v23 = vadd.f32 %v4253_v48, %v395_v62  ;;  %3367 = vmatprep.mubr.f32.mxu1 %v912_v61  ;;  %v2513_v30 = vadd.f32 -1.0, %v3732_v6  ;;  %vm607_vm1 = vcmp.gt.f32.partialorder %v4281_v8, 0.0 }
 0x19f   :  { %3743 = vpow2.f32 %v756_v50  ;;  %v667_v22 = vmin.f32 %v4482_v59, 0.0  ;;  %3368 = vmatmul.mubr.f32.gmra.mrb[50].mxu1 %v913_v47  ;;  %v2512_v27 = vadd.f32 -1.0, %v3734_v57  ;;  %vm603_vm13 = vcmp.gt.f32.partialorder %v4482_v59, 0.0 }
 0x1a0   :  { %3745 = vpow2.f32 %v754_v37  ;;  %v666_v58 = vmin.f32 %v4489_v23, 0.0  ;;  %v3259_v32 = vpop.f32.mrb[30].mxu0  ;;  %v4500_v63 = vpop.f32.mrb[30].mxu1  ;;  %v915_v61 = vsel %vm595_vm5, %v4409_v11, %v2513_v30  ;;  %v770_v37 = vmul.f32 1.442695, %v672_v20 }
 0x1a1   :  { %v3736_v18 = vpop.eup %3735  ;;  %v760_v17 = vmul.f32 1.442695, %v667_v22  ;;  %v4503_v36 = vadd.f32 %v3259_v32, %v4253_v48  ;;  %v405_v5 = vpop.f32.mrb[31].mxu0  ;;  %v914_v31 = vsel %vm594_vm4, %v4416_v53, %v2512_v27  ;;  %v4516_v53 = vadd.f32 %v4275_v4, %v4253_v48 }
 0x1a2   :  { %v4507_v6 = vpop.f32.mrb[31].mxu1  ;;  %v3738_v9 = vpop.eup %3737  ;;  %v758_v50 = vmul.f32 1.442695, %v666_v58  ;;  %v4510_v62 = vadd.f32 %v4253_v48, %v405_v5  ;;  %3370 = vmatprep.mubr.f32.mxu1 %v914_v31  ;;  %v2515_v57 = vadd.f32 -1.0, %v3736_v18  ;;  %v674_v32 = vmin.f32 %v4496_v29, 0.0 }
 0x1a3   :  { %3747 = vpow2.f32 %v760_v17  ;;  %v669_v47 = vmin.f32 %v4503_v36, 0.0  ;;  %3371 = vmatmul.mubr.f32.gmra.mrb[52].mxu1 %v915_v61  ;;  %v2514_v22 = vadd.f32 -1.0, %v3738_v9  ;;  %v4525_v18 = vadd.f32 %v4253_v48, %v4299_v21 }
 0x1a4   :  { %3749 = vpow2.f32 %v758_v50  ;;  %v668_v27 = vmin.f32 %v4510_v62, 0.0  ;;  %v917_v17 = vsel %vm597_vm7, %v4425_v10, %v2515_v57  ;;  %v4530_v31 = vadd.f32 %v4293_v16, %v4253_v48 }
 0x1a5   :  { %v3740_v58 = vpop.eup %3739  ;;  %v764_v11 = vmul.f32 1.442695, %v669_v47  ;;  %v916_v30 = vsel %vm596_vm6, %v4432_v0, %v2514_v22  ;;  %v772_v0 = vmul.f32 1.442695, %v673_v40  ;;  %v4536_v21 = vadd.f32 %v4253_v48, %v4312_v34 }
 0x1a6   :  { %v3742_v20 = vpop.eup %3741  ;;  %v762_v4 = vmul.f32 1.442695, %v668_v27  ;;  %3373 = vmatprep.mubr.f32.mxu1 %v916_v30  ;;  %v2517_v5 = vadd.f32 -1.0, %v3740_v58  ;;  %v675_v10 = vmin.f32 %v4516_v53, 0.0  ;;  %v774_v57 = vmul.f32 1.442695, %v674_v32 }
 0x1a7   :  { %3751 = vpow2.f32 %v764_v11  ;;  %3374 = vmatmul.mubr.f32.gmra.mrb[54].mxu1 %v917_v17  ;;  %v2516_v9 = vadd.f32 -1.0, %v3742_v20  ;;  %v676_v47 = vmin.f32 %v4525_v18, 0.0  ;;  %v677_v34 = vmin.f32 %v4530_v31, 0.0 }
 0x1a8   :  { %3753 = vpow2.f32 %v762_v4  ;;  %v919_v40 = vsel %vm599_vm9, %v4441_v42, %v2517_v5  ;;  %v776_v32 = vmul.f32 1.442695, %v675_v10  ;;  %v4553_v11 = vadd.f32 %v4253_v48, %v4327_v52 }
 0x1a9   :  { %v3744_v50 = vpop.eup %3743  ;;  %3755 = vpow2.f32 %v770_v37  ;;  %v918_v16 = vsel %vm598_vm8, %v4448_v55, %v2516_v9  ;;  %v4547_v37 = vadd.f32 %v4307_v28, %v4253_v48  ;;  %v678_v55 = vmin.f32 %v4536_v21, 0.0 }
 0x1aa   :  { %v3746_v61 = vpop.eup %3745  ;;  %3376 = vmatprep.mubr.f32.mxu1 %v918_v16  ;;  %v2519_v22 = vadd.f32 -1.0, %v3744_v50  ;;  %3757 = vpow2.f32 %v772_v0  ;;  %v778_v20 = vmul.f32 1.442695, %v676_v47  ;;  %v780_v17 = vmul.f32 1.442695, %v677_v34 }
 0x1ab   :  { %3377 = vmatmul.mubr.f32.gmra.mrb[56].mxu1 %v919_v40  ;;  %v2518_v27 = vadd.f32 -1.0, %v3746_v61  ;;  %3759 = vpow2.f32 %v774_v57  ;;  %v679_v9 = vmin.f32 %v4547_v37, 0.0  ;;  %v782_v0 = vmul.f32 1.442695, %v678_v55 }
 0x1ac   :  { %v921_v28 = vsel %vm601_vm11, %v4461_v14, %v2519_v22  ;;  %v4561_v52 = vadd.f32 %v4321_v44, %v4253_v48  ;;  %vm602_vm12 = vcmp.gt.f32.partialorder %v4489_v23, 0.0  ;;  %3761 = vpow2.f32 %v776_v32 }
 0x1ad   :  { %v3748_v58 = vpop.eup %3747  ;;  %v920_v42 = vsel %vm600_vm10, %v4468_v60, %v2518_v27  ;;  %v680_v50 = vmin.f32 %v4553_v11, 0.0  ;;  %3763 = vpow2.f32 %v778_v20  ;;  %v4569_v16 = vadd.f32 %v4253_v48, %v4345_v12 }
 0x1ae   :  { %v3750_v30 = vpop.eup %3749  ;;  %3379 = vmatprep.mubr.f32.mxu1 %v920_v42  ;;  %v2521_v4 = vadd.f32 -1.0, %v3748_v58  ;;  %3765 = vpow2.f32 %v780_v17  ;;  %v784_v40 = vmul.f32 1.442695, %v679_v9  ;;  %v681_v22 = vmin.f32 %v4561_v52, 0.0 }
 0x1af   :  { %3380 = vmatmul.mubr.f32.gmra.mrb[58].mxu1 %v921_v28  ;;  %v2520_v5 = vadd.f32 -1.0, %v3750_v30  ;;  %3767 = vpow2.f32 %v782_v0  ;;  %vm604_vm15 = vcmp.gt.f32.partialorder %v4510_v62, 0.0  ;;  %v786_v12 = vmul.f32 1.442695, %v680_v50 }
 0x1b0   :  { %v923_v44 = vsel %vm603_vm13, %v4482_v59, %v2521_v4  ;;  %v4578_v34 = vadd.f32 %v4339_v51, %v4253_v48  ;;  %vm605_vm0 = vcmp.gt.f32.partialorder %v4503_v36, 0.0  ;;  %v682_v55 = vmin.f32 %v4569_v16, 0.0 }
 0x1b1   :  { %v3752_v60 = vpop.eup %3751  ;;  %v922_v10 = vsel %vm602_vm12, %v4489_v23, %v2520_v5  ;;  %v2524_v23 = vadd.f32 -1.0, %v4385_v2  ;;  %v4585_v2 = vadd.f32 %v4253_v48, %v4361_v33  ;;  %v2525_v32 = vadd.f32 -1.0, %v4367_v41 }
 0x1b2   :  { %v3754_v14 = vpop.eup %3753  ;;  %3382 = vmatprep.mubr.f32.mxu1 %v922_v10  ;;  %v2523_v61 = vadd.f32 -1.0, %v3752_v60  ;;  %3769 = vpow2.f32 %v784_v40  ;;  %v4595_v30 = vadd.f32 %v4354_v26, %v4253_v48  ;;  %vm608_vm2 = vcmp.gt.f32.partialorder %v4473_v35, 0.0 }
 0x1b3   :  { %v3756_v57 = vpop.eup %3755  ;;  %3383 = vmatmul.mubr.f32.gmra.mrb[60].mxu1 %v923_v44  ;;  %v2522_v47 = vadd.f32 -1.0, %v3754_v14  ;;  %v926_v51 = vsel %vm606_vm14, %v4291_v15, %v2524_v23  ;;  %v788_v33 = vmul.f32 1.442695, %v681_v22  ;;  %3771 = vpow2.f32 %v786_v12 }
 0x1b4   :  { %v3758_v27 = vpop.eup %3757  ;;  %v925_v58 = vsel %vm605_vm0, %v4503_v36, %v2523_v61  ;;  %v683_v41 = vmin.f32 %v4578_v34, 0.0  ;;  %v4601_v36 = vadd.f32 %v4253_v48, %v4379_v56  ;;  %v790_v15 = vmul.f32 1.442695, %v682_v55 }
 0x1b5   :  { %v924_v59 = vsel %vm604_vm15, %v4510_v62, %v2522_v47  ;;  %v2526_v62 = vadd.f32 -1.0, %v3756_v57  ;;  %v3760_v42 = vpop.eup %3759  ;;  %v684_v20 = vmin.f32 %v4585_v2, 0.0  ;;  %v927_v28 = vsel %vm607_vm1, %v4281_v8, %v2525_v32 }
 0x1b6   :  { %3385 = vmatprep.mubr.f32.mxu1 %v924_v59  ;;  %v2527_v4 = vadd.f32 -1.0, %v3758_v27  ;;  %v3762_v17 = vpop.eup %3761  ;;  %vm609_vm3 = vcmp.gt.f32.partialorder %v4455_v1, 0.0  ;;  %v2528_v5 = vadd.f32 -1.0, %v3760_v42  ;;  %v685_v0 = vmin.f32 %v4595_v30, 0.0 }
 0x1b7   :  { %3386 = vmatmul.mubr.f32.gmra.mrb[62].mxu1 %v925_v58  ;;  %v928_v26 = vsel %vm608_vm2, %v4473_v35, %v2526_v62  ;;  %v3764_v9 = vpop.eup %3763  ;;  %v4610_v56 = vadd.f32 %v4372_v46, %v4253_v48  ;;  %vm610_vm4 = vcmp.gt.f32.partialorder %v4496_v29, 0.0  ;;  %3773 = vpow2.f32 %v788_v33 }
 0x1b8   :  { %3388 = vmatprep.mubr.f32.mxu1 %v926_v51  ;;  %v3766_v60 = vpop.eup %3765  ;;  %v792_v8 = vmul.f32 1.442695, %v683_v41  ;;  %v686_v50 = vmin.f32 %v4601_v36, 0.0  ;;  %v4616_v35 = vadd.f32 %v4253_v48, %v4397_v24  ;;  %3775 = vpow2.f32 %v790_v15 }
 0x1b9   :  { %v3768_v10 = vpop.eup %3767  ;;  %v794_v14 = vmul.f32 1.442695, %v684_v20  ;;  %v929_v44 = vsel %vm609_vm3, %v4455_v1, %v2527_v4  ;;  %v2529_v61 = vadd.f32 -1.0, %v3762_v17  ;;  %v930_v46 = vsel %vm610_vm4, %v4496_v29, %v2528_v5 }
 0x1ba   :  { %vm611_vm5 = vcmp.gt.f32.partialorder %v4516_v53, 0.0  ;;  %v2530_v57 = vadd.f32 -1.0, %v3764_v9  ;;  %v796_v47 = vmul.f32 1.442695, %v685_v0  ;;  %v687_v23 = vmin.f32 %v4610_v56, 0.0 }
 0x1bb   :  { %3389 = vmatmul.mubr.f32.gmra.mrb[64].mxu1 %v927_v28  ;;  %vm612_vm6 = vcmp.gt.f32.partialorder %v4525_v18, 0.0  ;;  %3777 = vpow2.f32 %v792_v8  ;;  %v798_v24 = vmul.f32 1.442695, %v686_v50  ;;  %v4625_v40 = vadd.f32 %v4390_v13, %v4253_v48 }
 0x1bc   :  { %3391 = vmatprep.mubr.f32.mxu1 %v928_v26  ;;  %v688_v1 = vmin.f32 %v4616_v35, 0.0  ;;  %v3770_v22 = vpop.eup %3769  ;;  %3779 = vpow2.f32 %v794_v14  ;;  %v4630_v29 = vadd.f32 %v4253_v48, %v4413_v45  ;;  %v931_v12 = vsel %vm611_vm5, %v4516_v53, %v2529_v61 }
 0x1bd   :  { %v2531_v59 = vadd.f32 -1.0, %v3766_v60  ;;  %v3772_v27 = vpop.eup %3771  ;;  %v932_v55 = vsel %vm612_vm6, %v4525_v18, %v2530_v57  ;;  %vm613_vm7 = vcmp.gt.f32.partialorder %v4530_v31, 0.0  ;;  %v2532_v58 = vadd.f32 -1.0, %v3768_v10 }
 0x1be   :  { %3781 = vpow2.f32 %v796_v47  ;;  %v800_v13 = vmul.f32 1.442695, %v687_v23  ;;  %vm614_vm8 = vcmp.gt.f32.partialorder %v4536_v21, 0.0  ;;  %v689_v32 = vmin.f32 %v4625_v40, 0.0 }
 0x1bf   :  { %3392 = vmatmul.mubr.f32.gmra.mrb[66].mxu1 %v929_v44  ;;  %3783 = vpow2.f32 %v798_v24  ;;  %v802_v45 = vmul.f32 1.442695, %v688_v1  ;;  %v4639_v53 = vadd.f32 %v4406_v39, %v4253_v48  ;;  %v690_v51 = vmin.f32 %v4630_v29, 0.0  ;;  %v3943_v24 = vld [vmem:[#allocation7] ss:$0 sm:$0xff] }
 0x1c0   :  { %3394 = vmatprep.mubr.f32.mxu1 %v930_v46  ;;  %v4644_v18 = vadd.f32 %v4253_v48, %v4429_v19  ;;  %v933_v62 = vsel %vm613_vm7, %v4530_v31, %v2531_v59  ;;  %v2533_v42 = vadd.f32 -1.0, %v3770_v22  ;;  %v4649_v41 = vadd.f32 %v4422_v3, %v4253_v48  ;;  %v1751_v59 = vld [vmem:[#allocation11 + $0x8] sm:$0xff] }
 0x1c1   :  { %v3774_v33 = vpop.eup %3773  ;;  %v934_v15 = vsel %vm614_vm8, %v4536_v21, %v2532_v58  ;;  %vm615_vm9 = vcmp.gt.f32.partialorder %v4547_v37, 0.0  ;;  %v2534_v39 = vadd.f32 -1.0, %v3772_v27  ;;  %3785 = vpow2.f32 %v800_v13  ;;  %v1752_v27 = vld [vmem:[#allocation11 + $0x10] sm:$0xff] }
 0x1c2   :  { %v3776_v20 = vpop.eup %3775  ;;  %v4655_v19 = vadd.f32 %v4253_v48, %v4445_v43  ;;  %vm616_vm10 = vcmp.gt.f32.partialorder %v4553_v11, 0.0  ;;  %v804_v31 = vmul.f32 1.442695, %v689_v32  ;;  %3787 = vpow2.f32 %v802_v45 }
 0x1c3   :  { %3395 = vmatmul.mubr.f32.gmra.mrb[68].mxu1 %v931_v12  ;;  %v691_v3 = vmin.f32 %v4639_v53, 0.0  ;;  %v806_v28 = vmul.f32 1.442695, %v690_v51  ;;  %v692_v4 = vmin.f32 %v4644_v18, 0.0  ;;  %v935_v21 = vsel %vm615_vm9, %v4547_v37, %v2533_v42 }
 0x1c4   :  { %3397 = vmatprep.mubr.f32.mxu1 %v932_v55  ;;  %v2535_v17 = vadd.f32 -1.0, %v3774_v33  ;;  %v693_v5 = vmin.f32 %v4649_v41, 0.0  ;;  %v936_v43 = vsel %vm616_vm10, %v4553_v11, %v2534_v39  ;;  %vm617_vm11 = vcmp.gt.f32.partialorder %v4561_v52, 0.0  ;;  %v1753_v55 = vld [vmem:[#allocation11 + $0x18] sm:$0xff]  ;;  %v1754_v39 = vld [vmem:[#allocation11 + $0x20] sm:$0xff] }
 0x1c5   :  { %v3778_v26 = vpop.eup %3777  ;;  %v2536_v9 = vadd.f32 -1.0, %v3776_v20  ;;  %v4666_v60 = vadd.f32 %v4438_v38, %v4253_v48  ;;  %v694_v8 = vmin.f32 %v4655_v19, 0.0  ;;  %vm618_vm12 = vcmp.gt.f32.partialorder %v4569_v16, 0.0  ;;  %v1755_v20 = vld [vmem:[#allocation11 + $0x28] sm:$0xff] }
 0x1c6   :  { %v3780_v0 = vpop.eup %3779  ;;  %3789 = vpow2.f32 %v804_v31  ;;  %v808_v37 = vmul.f32 1.442695, %v691_v3  ;;  %v4672_v50 = vadd.f32 %v4253_v48, %v4465_v25  ;;  %v810_v10 = vmul.f32 1.442695, %v692_v4 }
 0x1c7   :  { %3398 = vmatmul.mubr.f32.gmra.mrb[70].mxu1 %v933_v62  ;;  %3791 = vpow2.f32 %v806_v28  ;;  %v937_v14 = vsel %vm617_vm11, %v4561_v52, %v2535_v17  ;;  %v2537_v44 = vadd.f32 -1.0, %v3778_v26  ;;  %v812_v38 = vmul.f32 1.442695, %v693_v5  ;;  %v1750_v52 = vld [vmem:[#allocation11] sm:$0xff] }
 0x1c8   :  { %3400 = vmatprep.mubr.f32.mxu1 %v934_v15  ;;  %v3782_v11 = vpop.eup %3781  ;;  %v938_v46 = vsel %vm618_vm12, %v4569_v16, %v2536_v9  ;;  %vm619_vm13 = vcmp.gt.f32.partialorder %v4578_v34, 0.0  ;;  %v2538_v57 = vadd.f32 -1.0, %v3780_v0  ;;  %v695_v47 = vmin.f32 %v4666_v60, 0.0  ;;  %v1757_v9 = vld [vmem:[#allocation11 + $0x38] sm:$0xff] }
 0x1c9   :  { %v3784_v61 = vpop.eup %3783  ;;  %v814_v23 = vmul.f32 1.442695, %v694_v8  ;;  %v4679_v48 = vadd.f32 %v3943_v24, %v4458_v7  ;;  %vm620_vm14 = vcmp.gt.f32.partialorder %v4585_v2, 0.0  ;;  %3793 = vpow2.f32 %v808_v37 }
 0x1ca   :  { %v696_v25 = vmin.f32 %v4672_v50, 0.0  ;;  %3795 = vpow2.f32 %v810_v10  ;;  %v4684_v16 = vadd.f32 %v3943_v24, %v4486_v54  ;;  %v939_v22 = vsel %vm619_vm13, %v4578_v34, %v2537_v44 }
 0x1cb   :  { %3401 = vmatmul.mubr.f32.gmra.mrb[72].mxu1 %v935_v21  ;;  %v3786_v1 = vpop.eup %3785  ;;  %v2539_v12 = vadd.f32 -1.0, %v3782_v11  ;;  %3797 = vpow2.f32 %v812_v38  ;;  %v940_v58 = vsel %vm620_vm14, %v4585_v2, %v2538_v57  ;;  %vm621_vm15 = vcmp.gt.f32.partialorder %v4595_v30, 0.0  ;;  %v1759_v57 = vld [vmem:[#allocation11 + $0x48] sm:$0xff] }
 0x1cc   :  { %3403 = vmatprep.mubr.f32.mxu1 %v936_v43  ;;  %v3788_v7 = vpop.eup %3787  ;;  %v2540_v13 = vadd.f32 -1.0, %v3784_v61  ;;  %v816_v32 = vmul.f32 1.442695, %v695_v47  ;;  %3799 = vpow2.f32 %v814_v23  ;;  %v697_v45 = vmin.f32 %v4679_v48, 0.0  ;;  %v1756_v43 = vld [vmem:[#allocation11 + $0x30] sm:$0xff] }
 0x1cd   :  { %vm622_vm0 = vcmp.gt.f32.partialorder %v4601_v36, 0.0  ;;  %v818_v54 = vmul.f32 1.442695, %v696_v25  ;;  %v4692_v34 = vadd.f32 %v3943_v24, %v4479_v49  ;;  %v3628_v51 = vpack.c.bf16 %v1751_v59, %v1750_v52 }
 0x1ce   :  { %v3632_v62 = vpack.c.bf16 %v1753_v55, %v1752_v27  ;;  %v698_v42 = vmin.f32 %v4684_v16, 0.0  ;;  %v4696_v2 = vadd.f32 %v3943_v24, %v4507_v6  ;;  %v941_v33 = vsel %vm621_vm15, %v4595_v30, %v2539_v12  ;;  %v1761_v12 = vld [vmem:[#allocation11 + $0x58] sm:$0xff] }
 0x1cf   :  { %3404 = vmatmul.mubr.f32.gmra.mrb[74].mxu1 %v937_v14  ;;  %v2541_v15 = vadd.f32 -1.0, %v3786_v1  ;;  %v942_v3 = vsel %vm622_vm0, %v4601_v36, %v2540_v13  ;;  %vm623_vm1 = vcmp.gt.f32.partialorder %v4610_v56, 0.0  ;;  %v2542_v49 = vadd.f32 -1.0, %v3788_v7  ;;  %3629 = vmatprep.subr.bf16.mxu0 %v3628_v51  ;;  %v1763_v13 = vld [vmem:[#allocation11 + $0x68] sm:$0xff] }
 0x1d0   :  { %3406 = vmatprep.mubr.f32.mxu1 %v938_v46  ;;  %v3790_v31 = vpop.eup %3789  ;;  %3801 = vpow2.f32 %v816_v32  ;;  %v820_v4 = vmul.f32 1.442695, %v697_v45  ;;  %vm624_vm2 = vcmp.gt.f32.partialorder %v4616_v35, 0.0  ;;  %3631 = vmatpush3.bf16.msra.mxu0 %v3628_v51  ;;  %v699_v6 = vmin.f32 %v4692_v34, 0.0  ;;  %v1758_v46 = vld [vmem:[#allocation11 + $0x40] sm:$0xff] }
 0x1d1   :  { %v3792_v28 = vpop.eup %3791  ;;  %3803 = vpow2.f32 %v818_v54  ;;  %v4704_v30 = vadd.f32 %v3943_v24, %v4500_v63  ;;  %3633 = vmatprep.subr.bf16.mxu0 %v3632_v62  ;;  %v3636_v21 = vpack.c.bf16 %v1755_v20, %v1754_v39  ;;  %v822_v36 = vmul.f32 1.442695, %v698_v42  ;;  %v1764_v42 = vld [vmem:[#allocation11 + $0x70] sm:$0xff] }
 0x1d2   :  { %v700_v17 = vmin.f32 %v4696_v2, 0.0  ;;  %v943_v26 = vsel %vm623_vm1, %v4610_v56, %v2541_v15  ;;  %v2543_v5 = vadd.f32 -1.0, %v3790_v31  ;;  %v944_v8 = vsel %vm624_vm2, %v4616_v35, %v2542_v49 }
 0x1d3   :  { %3407 = vmatmul.mubr.f32.gmra.mrb[76].mxu1 %v939_v22  ;;  %v3794_v0 = vpop.eup %3793  ;;  %vm625_vm3 = vcmp.gt.f32.partialorder %v4625_v40, 0.0  ;;  %v2544_v63 = vadd.f32 -1.0, %v3792_v28  ;;  %vm626_vm4 = vcmp.gt.f32.partialorder %v4630_v29, 0.0  ;;  %3805 = vpow2.f32 %v820_v4  ;;  %v1760_v22 = vld [vmem:[#allocation11 + $0x50] sm:$0xff] }
 0x1d4   :  { %3409 = vmatprep.mubr.f32.mxu1 %v940_v58  ;;  %v3796_v37 = vpop.eup %3795  ;;  %3635 = vmatpush3.bf16.msra.mxu0 %v3632_v62  ;;  %v824_v10 = vmul.f32 1.442695, %v699_v6  ;;  %v701_v56 = vmin.f32 %v4704_v30, 0.0  ;;  %v3640_v14 = vpack.c.bf16 %v1757_v9, %v1756_v43  ;;  %3807 = vpow2.f32 %v822_v36  ;;  %v1762_v58 = vld [vmem:[#allocation11 + $0x60] sm:$0xff] }
 0x1d5   :  { %v3798_v11 = vpop.eup %3797  ;;  %3637 = vmatprep.subr.bf16.mxu0 %v3636_v21  ;;  %v826_v61 = vmul.f32 1.442695, %v700_v17  ;;  %v945_v35 = vsel %vm625_vm3, %v4625_v40, %v2543_v5  ;;  %v2545_v38 = vadd.f32 -1.0, %v3794_v0  ;;  %v946_v47 = vsel %vm626_vm4, %v4630_v29, %v2544_v63 }
 0x1d6   :  { %v3800_v44 = vpop.eup %3799  ;;  %vm627_vm5 = vcmp.gt.f32.partialorder %v4639_v53, 0.0  ;;  %v2546_v23 = vadd.f32 -1.0, %v3796_v37  ;;  %vm628_vm6 = vcmp.gt.f32.partialorder %v4644_v18, 0.0  ;;  %3809 = vpow2.f32 %v824_v10 }
 0x1d7   :  { %3410 = vmatmul.mubr.f32.gmra.mrb[78].mxu1 %v941_v33  ;;  %v828_v24 = vmul.f32 1.442695, %v701_v56  ;;  %v3644_v25 = vpack.c.bf16 %v1759_v57, %v1758_v46  ;;  %3811 = vpow2.f32 %v826_v61  ;;  %v947_v52 = vsel %vm627_vm5, %v4639_v53, %v2545_v38  ;;  %v1765_v33 = vld [vmem:[#allocation11 + $0x78] sm:$0xff] }
 0x1d8   :  { %3412 = vmatprep.mubr.f32.mxu1 %v942_v3  ;;  %3639 = vmatpush3.bf16.msra.mxu0 %v3636_v21  ;;  %v2547_v1 = vadd.f32 -1.0, %v3798_v11  ;;  %v948_v29 = vsel %vm628_vm6, %v4644_v18, %v2546_v23  ;;  %vm629_vm7 = vcmp.gt.f32.partialorder %v4649_v41, 0.0  ;;  %v2548_v27 = vadd.f32 -1.0, %v3800_v44 }
 0x1d9   :  { %3641 = vmatprep.subr.bf16.mxu0 %v3640_v14  ;;  %vm630_vm8 = vcmp.gt.f32.partialorder %v4655_v19, 0.0  ;;  %3813 = vpow2.f32 %v828_v24  ;;  %v3648_v55 = vpack.c.bf16 %v1761_v12, %v1760_v22  ;;  %vm631_vm9 = vcmp.gt.f32.partialorder %v4666_v60, 0.0 }
 0x1da   :  { %v3802_v40 = vpop.eup %3801  ;;  %v949_v7 = vsel %vm629_vm7, %v4649_v41, %v2547_v1  ;;  %v950_v45 = vsel %vm630_vm8, %v4655_v19, %v2548_v27  ;;  %vm632_vm10 = vcmp.gt.f32.partialorder %v4672_v50, 0.0  ;;  %v3652_v51 = vpack.c.bf16 %v1763_v13, %v1762_v58 }
 0x1db   :  { %3413 = vmatmul.mubr.f32.gmra.mrb[80].mxu1 %v943_v26  ;;  %v3804_v59 = vpop.eup %3803  ;;  %v2549_v53 = vadd.f32 -1.0, %v3802_v40  ;;  %vm633_vm11 = vcmp.gt.f32.partialorder %v4679_v48, 0.0  ;;  %vm634_vm12 = vcmp.gt.f32.partialorder %v4684_v16, 0.0  ;;  %v3656_v31 = vpack.c.bf16 %v1765_v33, %v1764_v42 }
 0x1dc   :  { %3415 = vmatprep.mubr.f32.mxu1 %v944_v8  ;;  %3643 = vmatpush3.bf16.msra.mxu0 %v3640_v14  ;;  %v2550_v18 = vadd.f32 -1.0, %v3804_v59  ;;  %vm635_vm13 = vcmp.gt.f32.partialorder %v4692_v34, 0.0  ;;  %vm636_vm14 = vcmp.gt.f32.partialorder %v4696_v2, 0.0  ;;  %vm637_vm15 = vcmp.gt.f32.partialorder %v4704_v30, 0.0 }
 0x1dd   :  { %3645 = vmatprep.subr.bf16.mxu0 %v3644_v25  ;;  %v3806_v32 = vpop.eup %3805  ;;  %v951_v62 = vsel %vm631_vm9, %v4666_v60, %v2549_v53 }
 0x1de   :  { %v3808_v54 = vpop.eup %3807  ;;  %v2551_v41 = vadd.f32 -1.0, %v3806_v32  ;;  %v952_v39 = vsel %vm632_vm10, %v4672_v50, %v2550_v18 }
 0x1df   :  { %3416 = vmatmul.mubr.f32.gmra.mrb[82].mxu1 %v945_v35  ;;  %v2552_v19 = vadd.f32 -1.0, %v3808_v54 }
 0x1e0   :  { %3418 = vmatprep.mubr.f32.mxu1 %v946_v47  ;;  %3647 = vmatpush3.bf16.msra.mxu0 %v3644_v25  ;;  %v3810_v15 = vpop.eup %3809  ;;  %v953_v3 = vsel %vm633_vm11, %v4679_v48, %v2551_v41 }
 0x1e1   :  { %3649 = vmatprep.subr.bf16.mxu0 %v3648_v55  ;;  %v3812_v20 = vpop.eup %3811  ;;  %v2553_v60 = vadd.f32 -1.0, %v3810_v15  ;;  %v954_v28 = vsel %vm634_vm12, %v4684_v16, %v2552_v19  ;;  %v4740_v16 = vld [vmem:[#allocation10] ss:$0 sm:$0xff] }
 0x1e2   :  { %v2554_v50 = vadd.f32 -1.0, %v3812_v20 }
 0x1e3   :  { %3419 = vmatmul.mubr.f32.gmra.mrb[84].mxu1 %v947_v52  ;;  %v3814_v49 = vpop.eup %3813  ;;  %v955_v4 = vsel %vm635_vm13, %v4692_v34, %v2553_v60 }
 0x1e4   :  { %3421 = vmatprep.mubr.f32.mxu1 %v948_v29  ;;  %3651 = vmatpush3.bf16.msra.mxu0 %v3648_v55  ;;  %v2555_v6 = vadd.f32 -1.0, %v3814_v49  ;;  %v956_v21 = vsel %vm636_vm14, %v4696_v2, %v2554_v50 }
 0x1e5   :  { %3653 = vmatprep.subr.bf16.mxu0 %v3652_v51 }
 0x1e6   :  { %v957_v48 = vsel %vm637_vm15, %v4704_v30, %v2555_v6 }
 0x1e7   :  { %3422 = vmatmul.mubr.f32.gmra.mrb[86].mxu1 %v949_v7 }
 0x1e8   :  { %3424 = vmatprep.mubr.f32.mxu1 %v950_v45  ;;  %3655 = vmatpush3.bf16.msra.mxu0 %v3652_v51 }
 0x1e9   :  { %3657 = vmatprep.subr.bf16.mxu0 %v3656_v31 }
 0x1eb   :  { %3425 = vmatmul.mubr.f32.gmra.mrb[88].mxu1 %v951_v62 }
 0x1ec   :  { %3427 = vmatprep.mubr.f32.mxu1 %v952_v39  ;;  %3659 = vmatpush3.bf16.msra.mxu0 %v3656_v31 }
 0x1ef   :  { %3428 = vmatmul.mubr.f32.gmra.mrb[90].mxu1 %v953_v3 }
 0x1f0   :  { %3430 = vmatprep.mubr.f32.mxu1 %v954_v28 }
 0x1f3   :  { %3431 = vmatmul.mubr.f32.gmra.mrb[92].mxu1 %v955_v4 }
 0x1f4   :  { %3433 = vmatprep.mubr.f32.mxu1 %v956_v21 }
 0x1f7   :  { %3434 = vmatmul.mubr.f32.gmra.mrb[94].mxu1 %v957_v48 }
 0x24e   :  { %v3342_v36 = vpop.f32.mrb[32].mxu1 }
 0x24f   :  { %v1053_v17 = vadd.f32 %v3342_v36, %v4740_v16  ;;  %v1047_v26 = vpop.f32.mrb[33].mxu1 }
 0x250   :  { %v1048_v5 = vadd.f32 %v4740_v16, %v1047_v26 }
 0x251   :  { %v1431_v34 = vmin.f32 %v1053_v17, 0.0  ;;  %vm1367_vm1 = vcmp.gt.f32.partialorder %v1053_v17, 0.0 }
 0x252   :  { %v1430_v43 = vmin.f32 %v1048_v5, 0.0  ;;  %v3345_v9 = vpop.f32.mrb[34].mxu1  ;;  %vm1366_vm0 = vcmp.gt.f32.partialorder %v1048_v5, 0.0 }
 0x253   :  { %v1496_v0 = vmul.f32 1.442695, %v1431_v34  ;;  %v4745_v2 = vadd.f32 %v3345_v9, %v4740_v16  ;;  %v1057_v8 = vpop.f32.mrb[35].mxu1 }
 0x254   :  { %v1494_v63 = vmul.f32 1.442695, %v1430_v43  ;;  %v4748_v30 = vadd.f32 %v4740_v16, %v1057_v8 }
 0x255   :  { %3815 = vpow2.f32 %v1496_v0  ;;  %v1433_v37 = vmin.f32 %v4745_v2, 0.0  ;;  %vm1369_vm3 = vcmp.gt.f32.partialorder %v4745_v2, 0.0 }
 0x256   :  { %3817 = vpow2.f32 %v1494_v63  ;;  %v1432_v11 = vmin.f32 %v4748_v30, 0.0  ;;  %v3348_v10 = vpop.f32.mrb[36].mxu1  ;;  %vm1368_vm2 = vcmp.gt.f32.partialorder %v4748_v30, 0.0 }
 0x257   :  { %v1500_v56 = vmul.f32 1.442695, %v1433_v37  ;;  %v4753_v14 = vadd.f32 %v3348_v10, %v4740_v16  ;;  %v1067_v44 = vpop.f32.mrb[37].mxu1 }
 0x258   :  { %v1498_v61 = vmul.f32 1.442695, %v1432_v11  ;;  %v4756_v35 = vadd.f32 %v4740_v16, %v1067_v44 }
 0x259   :  { %3819 = vpow2.f32 %v1500_v56  ;;  %v1435_v38 = vmin.f32 %v4753_v14, 0.0  ;;  %vm1371_vm5 = vcmp.gt.f32.partialorder %v4753_v14, 0.0 }
 0x25a   :  { %3821 = vpow2.f32 %v1498_v61  ;;  %v1434_v46 = vmin.f32 %v4756_v35, 0.0  ;;  %v3351_v57 = vpop.f32.mrb[38].mxu1  ;;  %vm1370_vm4 = vcmp.gt.f32.partialorder %v4756_v35, 0.0 }
 0x25b   :  { %v1504_v47 = vmul.f32 1.442695, %v1435_v38  ;;  %v4761_v23 = vadd.f32 %v3351_v57, %v4740_v16  ;;  %v1077_v24 = vpop.f32.mrb[39].mxu1 }
 0x25c   :  { %v1502_v25 = vmul.f32 1.442695, %v1434_v46  ;;  %v4764_v40 = vadd.f32 %v4740_v16, %v1077_v24 }
 0x25d   :  { %3823 = vpow2.f32 %v1504_v47  ;;  %v1437_v52 = vmin.f32 %v4761_v23, 0.0  ;;  %vm1373_vm7 = vcmp.gt.f32.partialorder %v4761_v23, 0.0 }
 0x25e   :  { %3825 = vpow2.f32 %v1502_v25  ;;  %v1436_v1 = vmin.f32 %v4764_v40, 0.0  ;;  %v3354_v22 = vpop.f32.mrb[40].mxu1  ;;  %vm1372_vm6 = vcmp.gt.f32.partialorder %v4764_v40, 0.0 }
 0x25f   :  { %v3816_v12 = vpop.eup %3815  ;;  %v1508_v59 = vmul.f32 1.442695, %v1437_v52  ;;  %v4769_v29 = vadd.f32 %v3354_v22, %v4740_v16  ;;  %v1087_v27 = vpop.f32.mrb[41].mxu1 }
 0x260   :  { %v3818_v55 = vpop.eup %3817  ;;  %v2558_v7 = vadd.f32 -1.0, %v3816_v12  ;;  %v1506_v53 = vmul.f32 1.442695, %v1436_v1  ;;  %v4772_v58 = vadd.f32 %v4740_v16, %v1087_v27 }
 0x261   :  { %3827 = vpow2.f32 %v1508_v59  ;;  %v1439_v13 = vmin.f32 %v4769_v29, 0.0  ;;  %v2557_v32 = vadd.f32 -1.0, %v3818_v55  ;;  %vm1375_vm9 = vcmp.gt.f32.partialorder %v4769_v29, 0.0 }
 0x262   :  { %3829 = vpow2.f32 %v1506_v53  ;;  %v1438_v45 = vmin.f32 %v4772_v58, 0.0  ;;  %v3357_v18 = vpop.f32.mrb[42].mxu1  ;;  %v1687_v15 = vsel %vm1367_vm1, %v1053_v17, %v2558_v7  ;;  %vm1374_vm8 = vcmp.gt.f32.partialorder %v4772_v58, 0.0 }
 0x263   :  { %v3820_v54 = vpop.eup %3819  ;;  %v1512_v51 = vmul.f32 1.442695, %v1439_v13  ;;  %v4777_v62 = vadd.f32 %v3357_v18, %v4740_v16  ;;  %v1097_v41 = vpop.f32.mrb[43].mxu1  ;;  %v1686_v42 = vsel %vm1366_vm0, %v1048_v5, %v2557_v32 }
 0x264   :  { %v3822_v33 = vpop.eup %3821  ;;  %v1510_v39 = vmul.f32 1.442695, %v1438_v45  ;;  %v4780_v19 = vadd.f32 %v4740_v16, %v1097_v41  ;;  %3468 = vmatprep.mubr.f32.mxu0 %v1686_v42  ;;  %v2560_v20 = vadd.f32 -1.0, %v3820_v54 }
 0x265   :  { %3831 = vpow2.f32 %v1512_v51  ;;  %v1441_v31 = vmin.f32 %v4777_v62, 0.0  ;;  %3469 = vmatmul.mubr.f32.vlgmr.msra.gmra.mrb[32].mxu0 %v1687_v15  ;;  %v2559_v3 = vadd.f32 -1.0, %v3822_v33  ;;  %vm1377_vm11 = vcmp.gt.f32.partialorder %v4777_v62, 0.0 }
 0x266   :  { %3833 = vpow2.f32 %v1510_v39  ;;  %v1440_v60 = vmin.f32 %v4780_v19, 0.0  ;;  %v3360_v49 = vpop.f32.mrb[44].mxu1  ;;  %v1689_v26 = vsel %vm1369_vm3, %v4745_v2, %v2560_v20  ;;  %vm1376_vm10 = vcmp.gt.f32.partialorder %v4780_v19, 0.0 }
 0x267   :  { %v3824_v28 = vpop.eup %3823  ;;  %v1516_v50 = vmul.f32 1.442695, %v1441_v31  ;;  %v4786_v4 = vadd.f32 %v3360_v49, %v4740_v16  ;;  %v1107_v6 = vpop.f32.mrb[45].mxu1  ;;  %v1688_v21 = vsel %vm1368_vm2, %v4748_v30, %v2559_v3 }
 0x268   :  { %v3826_v48 = vpop.eup %3825  ;;  %v1514_v36 = vmul.f32 1.442695, %v1440_v60  ;;  %v4791_v17 = vadd.f32 %v4740_v16, %v1107_v6  ;;  %3471 = vmatprep.mubr.f32.mxu0 %v1688_v21  ;;  %v2562_v5 = vadd.f32 -1.0, %v3824_v28 }
 0x269   :  { %3835 = vpow2.f32 %v1516_v50  ;;  %v1443_v34 = vmin.f32 %v4786_v4, 0.0  ;;  %3472 = vmatmul.mubr.f32.gmra.mrb[34].mxu0 %v1689_v26  ;;  %v2561_v43 = vadd.f32 -1.0, %v3826_v48  ;;  %vm1379_vm13 = vcmp.gt.f32.partialorder %v4786_v4, 0.0 }
 0x26a   :  { %3837 = vpow2.f32 %v1514_v36  ;;  %v1442_v9 = vmin.f32 %v4791_v17, 0.0  ;;  %v3363_v0 = vpop.f32.mrb[46].mxu1  ;;  %v1691_v44 = vsel %vm1371_vm5, %v4753_v14, %v2562_v5  ;;  %vm1378_vm12 = vcmp.gt.f32.partialorder %v4791_v17, 0.0 }
 0x26b   :  { %v3828_v8 = vpop.eup %3827  ;;  %v1520_v63 = vmul.f32 1.442695, %v1443_v34  ;;  %v4798_v30 = vadd.f32 %v3363_v0, %v4740_v16  ;;  %v1117_v37 = vpop.f32.mrb[47].mxu1  ;;  %v1690_v2 = vsel %vm1370_vm4, %v4756_v35, %v2561_v43 }
 0x26c   :  { %v3830_v11 = vpop.eup %3829  ;;  %v1518_v10 = vmul.f32 1.442695, %v1442_v9  ;;  %v4803_v56 = vadd.f32 %v4740_v16, %v1117_v37  ;;  %3474 = vmatprep.mubr.f32.mxu0 %v1690_v2  ;;  %v2564_v61 = vadd.f32 -1.0, %v3828_v8 }
 0x26d   :  { %3839 = vpow2.f32 %v1520_v63  ;;  %v1445_v38 = vmin.f32 %v4798_v30, 0.0  ;;  %3475 = vmatmul.mubr.f32.gmra.mrb[36].mxu0 %v1691_v44  ;;  %v2563_v46 = vadd.f32 -1.0, %v3830_v11  ;;  %vm1381_vm15 = vcmp.gt.f32.partialorder %v4798_v30, 0.0 }
 0x26e   :  { %3841 = vpow2.f32 %v1518_v10  ;;  %v1444_v57 = vmin.f32 %v4803_v56, 0.0  ;;  %v3366_v35 = vpop.f32.mrb[48].mxu1  ;;  %v1693_v59 = vsel %vm1373_vm7, %v4761_v23, %v2564_v61  ;;  %vm1380_vm14 = vcmp.gt.f32.partialorder %v4803_v56, 0.0 }
 0x26f   :  { %v3832_v47 = vpop.eup %3831  ;;  %v1524_v24 = vmul.f32 1.442695, %v1445_v38  ;;  %v4810_v25 = vadd.f32 %v3366_v35, %v4740_v16  ;;  %v1127_v52 = vpop.f32.mrb[49].mxu1  ;;  %v1692_v14 = vsel %vm1372_vm6, %v4764_v40, %v2563_v46 }
 0x270   :  { %v3834_v1 = vpop.eup %3833  ;;  %v1522_v22 = vmul.f32 1.442695, %v1444_v57  ;;  %v4815_v12 = vadd.f32 %v4740_v16, %v1127_v52  ;;  %3477 = vmatprep.mubr.f32.mxu0 %v1692_v14  ;;  %v2566_v27 = vadd.f32 -1.0, %v3832_v47 }
 0x271   :  { %3843 = vpow2.f32 %v1524_v24  ;;  %v1447_v55 = vmin.f32 %v4810_v25, 0.0  ;;  %3478 = vmatmul.mubr.f32.gmra.mrb[38].mxu0 %v1693_v59  ;;  %v2565_v7 = vadd.f32 -1.0, %v3834_v1  ;;  %vm1383_vm1 = vcmp.gt.f32.partialorder %v4810_v25, 0.0 }
 0x272   :  { %3845 = vpow2.f32 %v1522_v22  ;;  %v1446_v53 = vmin.f32 %v4815_v12, 0.0  ;;  %v3369_v40 = vpop.f32.mrb[50].mxu1  ;;  %v1695_v42 = vsel %vm1375_vm9, %v4769_v29, %v2566_v27  ;;  %vm1382_vm0 = vcmp.gt.f32.partialorder %v4815_v12, 0.0 }
 0x273   :  { %v3836_v13 = vpop.eup %3835  ;;  %v1528_v32 = vmul.f32 1.442695, %v1447_v55  ;;  %v4822_v45 = vadd.f32 %v3369_v40, %v4740_v16  ;;  %v1137_v18 = vpop.f32.mrb[51].mxu1  ;;  %v1694_v23 = vsel %vm1374_vm8, %v4772_v58, %v2565_v7 }
 0x274   :  { %v3838_v54 = vpop.eup %3837  ;;  %v1526_v51 = vmul.f32 1.442695, %v1446_v53  ;;  %v4827_v41 = vadd.f32 %v4740_v16, %v1137_v18  ;;  %3480 = vmatprep.mubr.f32.mxu0 %v1694_v23  ;;  %v2568_v33 = vadd.f32 -1.0, %v3836_v13 }
 0x275   :  { %3847 = vpow2.f32 %v1528_v32  ;;  %v1449_v15 = vmin.f32 %v4822_v45, 0.0  ;;  %3481 = vmatmul.mubr.f32.gmra.mrb[40].mxu0 %v1695_v42  ;;  %v2567_v39 = vadd.f32 -1.0, %v3838_v54  ;;  %vm1385_vm3 = vcmp.gt.f32.partialorder %v4822_v45, 0.0 }
 0x276   :  { %3849 = vpow2.f32 %v1526_v51  ;;  %v1448_v20 = vmin.f32 %v4827_v41, 0.0  ;;  %v3372_v58 = vpop.f32.mrb[52].mxu1  ;;  %v1697_v21 = vsel %vm1377_vm11, %v4777_v62, %v2568_v33  ;;  %vm1384_vm2 = vcmp.gt.f32.partialorder %v4827_v41, 0.0 }
 0x277   :  { %v3840_v31 = vpop.eup %3839  ;;  %v1532_v3 = vmul.f32 1.442695, %v1449_v15  ;;  %v4834_v60 = vadd.f32 %v3372_v58, %v4740_v16  ;;  %v1147_v49 = vpop.f32.mrb[53].mxu1  ;;  %v1696_v29 = vsel %vm1376_vm10, %v4780_v19, %v2567_v39 }
 0x278   :  { %v3842_v28 = vpop.eup %3841  ;;  %v1530_v50 = vmul.f32 1.442695, %v1448_v20  ;;  %v4839_v6 = vadd.f32 %v4740_v16, %v1147_v49  ;;  %3483 = vmatprep.mubr.f32.mxu0 %v1696_v29  ;;  %v2570_v48 = vadd.f32 -1.0, %v3840_v31 }
 0x279   :  { %3851 = vpow2.f32 %v1532_v3  ;;  %v1451_v36 = vmin.f32 %v4834_v60, 0.0  ;;  %3484 = vmatmul.mubr.f32.gmra.mrb[42].mxu0 %v1697_v21  ;;  %v2569_v26 = vadd.f32 -1.0, %v3842_v28  ;;  %vm1387_vm5 = vcmp.gt.f32.partialorder %v4834_v60, 0.0 }
 0x27a   :  { %3853 = vpow2.f32 %v1530_v50  ;;  %v1450_v5 = vmin.f32 %v4839_v6, 0.0  ;;  %v3375_v19 = vpop.f32.mrb[54].mxu1  ;;  %v1699_v2 = vsel %vm1379_vm13, %v4786_v4, %v2570_v48  ;;  %vm1386_vm4 = vcmp.gt.f32.partialorder %v4839_v6, 0.0 }
 0x27b   :  { %v3844_v34 = vpop.eup %3843  ;;  %v1536_v43 = vmul.f32 1.442695, %v1451_v36  ;;  %v4846_v9 = vadd.f32 %v3375_v19, %v4740_v16  ;;  %v1157_v0 = vpop.f32.mrb[55].mxu1  ;;  %v1698_v62 = vsel %vm1378_vm12, %v4791_v17, %v2569_v26 }
 0x27c   :  { %v3846_v8 = vpop.eup %3845  ;;  %v1534_v63 = vmul.f32 1.442695, %v1450_v5  ;;  %v4851_v37 = vadd.f32 %v4740_v16, %v1157_v0  ;;  %3486 = vmatprep.mubr.f32.mxu0 %v1698_v62  ;;  %v2572_v11 = vadd.f32 -1.0, %v3844_v34 }
 0x27d   :  { %3855 = vpow2.f32 %v1536_v43  ;;  %v1453_v10 = vmin.f32 %v4846_v9, 0.0  ;;  %3487 = vmatmul.mubr.f32.gmra.mrb[44].mxu0 %v1699_v2  ;;  %v2571_v44 = vadd.f32 -1.0, %v3846_v8  ;;  %vm1389_vm7 = vcmp.gt.f32.partialorder %v4846_v9, 0.0 }
 0x27e   :  { %3857 = vpow2.f32 %v1534_v63  ;;  %v1452_v61 = vmin.f32 %v4851_v37, 0.0  ;;  %v3378_v17 = vpop.f32.mrb[56].mxu1  ;;  %v1701_v14 = vsel %vm1381_vm15, %v4798_v30, %v2572_v11  ;;  %vm1388_vm6 = vcmp.gt.f32.partialorder %v4851_v37, 0.0 }
 0x27f   :  { %v3848_v38 = vpop.eup %3847  ;;  %v1540_v46 = vmul.f32 1.442695, %v1453_v10  ;;  %v4858_v57 = vadd.f32 %v3378_v17, %v4740_v16  ;;  %v1167_v35 = vpop.f32.mrb[57].mxu1  ;;  %v1700_v4 = vsel %vm1380_vm14, %v4803_v56, %v2571_v44 }
 0x280   :  { %v3850_v47 = vpop.eup %3849  ;;  %v1538_v24 = vmul.f32 1.442695, %v1452_v61  ;;  %v4863_v52 = vadd.f32 %v4740_v16, %v1167_v35  ;;  %3489 = vmatprep.mubr.f32.mxu0 %v1700_v4  ;;  %v2574_v1 = vadd.f32 -1.0, %v3848_v38 }
 0x281   :  { %3859 = vpow2.f32 %v1540_v46  ;;  %v1455_v22 = vmin.f32 %v4858_v57, 0.0  ;;  %3490 = vmatmul.mubr.f32.gmra.mrb[46].mxu0 %v1701_v14  ;;  %v2573_v59 = vadd.f32 -1.0, %v3850_v47  ;;  %vm1391_vm9 = vcmp.gt.f32.partialorder %v4858_v57, 0.0 }
 0x282   :  { %3861 = vpow2.f32 %v1538_v24  ;;  %v1454_v27 = vmin.f32 %v4863_v52, 0.0  ;;  %v3381_v56 = vpop.f32.mrb[58].mxu1  ;;  %v1703_v23 = vsel %vm1383_vm1, %v4810_v25, %v2574_v1  ;;  %vm1390_vm8 = vcmp.gt.f32.partialorder %v4863_v52, 0.0 }
 0x283   :  { %v3852_v55 = vpop.eup %3851  ;;  %v1544_v7 = vmul.f32 1.442695, %v1455_v22  ;;  %v4870_v53 = vadd.f32 %v3381_v56, %v4740_v16  ;;  %v1177_v40 = vpop.f32.mrb[59].mxu1  ;;  %v1702_v30 = vsel %vm1382_vm0, %v4815_v12, %v2573_v59 }
 0x284   :  { %v3854_v13 = vpop.eup %3853  ;;  %v1542_v32 = vmul.f32 1.442695, %v1454_v27  ;;  %v4875_v18 = vadd.f32 %v4740_v16, %v1177_v40  ;;  %3492 = vmatprep.mubr.f32.mxu0 %v1702_v30  ;;  %v2576_v54 = vadd.f32 -1.0, %v3852_v55 }
 0x285   :  { %3863 = vpow2.f32 %v1544_v7  ;;  %v1457_v51 = vmin.f32 %v4870_v53, 0.0  ;;  %3493 = vmatmul.mubr.f32.gmra.mrb[48].mxu0 %v1703_v23  ;;  %v2575_v42 = vadd.f32 -1.0, %v3854_v13  ;;  %vm1393_vm11 = vcmp.gt.f32.partialorder %v4870_v53, 0.0 }
 0x286   :  { %3865 = vpow2.f32 %v1542_v32  ;;  %v1456_v33 = vmin.f32 %v4875_v18, 0.0  ;;  %v3384_v12 = vpop.f32.mrb[60].mxu1  ;;  %v1705_v29 = vsel %vm1385_vm3, %v4822_v45, %v2576_v54  ;;  %vm1392_vm10 = vcmp.gt.f32.partialorder %v4875_v18, 0.0 }
 0x287   :  { %v3856_v15 = vpop.eup %3855  ;;  %v1548_v39 = vmul.f32 1.442695, %v1457_v51  ;;  %v4882_v20 = vadd.f32 %v3384_v12, %v4740_v16  ;;  %v1187_v58 = vpop.f32.mrb[61].mxu1  ;;  %v1704_v25 = vsel %vm1384_vm2, %v4827_v41, %v2575_v42 }
 0x288   :  { %v3858_v31 = vpop.eup %3857  ;;  %v1546_v3 = vmul.f32 1.442695, %v1456_v33  ;;  %v4887_v49 = vadd.f32 %v4740_v16, %v1187_v58  ;;  %3495 = vmatprep.mubr.f32.mxu0 %v1704_v25  ;;  %v2578_v28 = vadd.f32 -1.0, %v3856_v15 }
 0x289   :  { %3867 = vpow2.f32 %v1548_v39  ;;  %v1459_v50 = vmin.f32 %v4882_v20, 0.0  ;;  %3496 = vmatmul.mubr.f32.gmra.mrb[50].mxu0 %v1705_v29  ;;  %v2577_v21 = vadd.f32 -1.0, %v3858_v31  ;;  %vm1395_vm13 = vcmp.gt.f32.partialorder %v4882_v20, 0.0 }
 0x28a   :  { %3869 = vpow2.f32 %v1546_v3  ;;  %v1458_v48 = vmin.f32 %v4887_v49, 0.0  ;;  %v3387_v41 = vpop.f32.mrb[62].mxu1  ;;  %v1707_v62 = vsel %vm1387_vm5, %v4834_v60, %v2578_v28  ;;  %vm1394_vm12 = vcmp.gt.f32.partialorder %v4887_v49, 0.0 }
 0x28b   :  { %v3860_v36 = vpop.eup %3859  ;;  %v1552_v26 = vmul.f32 1.442695, %v1459_v50  ;;  %v4894_v5 = vadd.f32 %v3387_v41, %v4740_v16  ;;  %v1197_v19 = vpop.f32.mrb[63].mxu1  ;;  %v1706_v45 = vsel %vm1386_vm4, %v4839_v6, %v2577_v21 }
 0x28c   :  { %v3862_v34 = vpop.eup %3861  ;;  %v1550_v43 = vmul.f32 1.442695, %v1458_v48  ;;  %v4899_v0 = vadd.f32 %v4740_v16, %v1197_v19  ;;  %3498 = vmatprep.mubr.f32.mxu0 %v1706_v45  ;;  %v2580_v8 = vadd.f32 -1.0, %v3860_v36 }
 0x28d   :  { %3871 = vpow2.f32 %v1552_v26  ;;  %v1461_v63 = vmin.f32 %v4894_v5, 0.0  ;;  %3499 = vmatmul.mubr.f32.gmra.mrb[52].mxu0 %v1707_v62  ;;  %v2579_v2 = vadd.f32 -1.0, %v3862_v34  ;;  %vm1397_vm15 = vcmp.gt.f32.partialorder %v4894_v5, 0.0 }
 0x28e   :  { %3873 = vpow2.f32 %v1550_v43  ;;  %v1460_v11 = vmin.f32 %v4899_v0, 0.0  ;;  %v3390_v6 = vpop.f32.mrb[64].mxu1  ;;  %v1709_v4 = vsel %vm1389_vm7, %v4846_v9, %v2580_v8  ;;  %vm1396_vm14 = vcmp.gt.f32.partialorder %v4899_v0, 0.0 }
 0x28f   :  { %v3864_v10 = vpop.eup %3863  ;;  %v1556_v44 = vmul.f32 1.442695, %v1461_v63  ;;  %v4906_v61 = vadd.f32 %v3390_v6, %v4740_v16  ;;  %v1207_v17 = vpop.f32.mrb[65].mxu1  ;;  %v1708_v60 = vsel %vm1388_vm6, %v4851_v37, %v2579_v2 }
 0x290   :  { %v3866_v38 = vpop.eup %3865  ;;  %v1554_v46 = vmul.f32 1.442695, %v1460_v11  ;;  %v4911_v35 = vadd.f32 %v4740_v16, %v1207_v17  ;;  %3501 = vmatprep.mubr.f32.mxu0 %v1708_v60  ;;  %v2582_v47 = vadd.f32 -1.0, %v3864_v10 }
 0x291   :  { %3875 = vpow2.f32 %v1556_v44  ;;  %v1463_v24 = vmin.f32 %v4906_v61, 0.0  ;;  %3502 = vmatmul.mubr.f32.gmra.mrb[54].mxu0 %v1709_v4  ;;  %v2581_v14 = vadd.f32 -1.0, %v3866_v38  ;;  %vm1399_vm1 = vcmp.gt.f32.partialorder %v4906_v61, 0.0 }
 0x292   :  { %3877 = vpow2.f32 %v1554_v46  ;;  %v1462_v1 = vmin.f32 %v4911_v35, 0.0  ;;  %v3393_v37 = vpop.f32.mrb[66].mxu1  ;;  %v1711_v30 = vsel %vm1391_vm9, %v4858_v57, %v2582_v47  ;;  %vm1398_vm0 = vcmp.gt.f32.partialorder %v4911_v35, 0.0 }
 0x293   :  { %v3868_v22 = vpop.eup %3867  ;;  %v1560_v59 = vmul.f32 1.442695, %v1463_v24  ;;  %v4918_v27 = vadd.f32 %v3393_v37, %v4740_v16  ;;  %v1217_v56 = vpop.f32.mrb[67].mxu1  ;;  %v1710_v9 = vsel %vm1390_vm8, %v4863_v52, %v2581_v14 }
 0x294   :  { %v3870_v55 = vpop.eup %3869  ;;  %v1558_v7 = vmul.f32 1.442695, %v1462_v1  ;;  %v4923_v40 = vadd.f32 %v4740_v16, %v1217_v56  ;;  %3504 = vmatprep.mubr.f32.mxu0 %v1710_v9  ;;  %v2584_v13 = vadd.f32 -1.0, %v3868_v22 }
 0x295   :  { %3879 = vpow2.f32 %v1560_v59  ;;  %v1465_v32 = vmin.f32 %v4918_v27, 0.0  ;;  %3505 = vmatmul.mubr.f32.gmra.mrb[56].mxu0 %v1711_v30  ;;  %v2583_v23 = vadd.f32 -1.0, %v3870_v55  ;;  %vm1401_vm3 = vcmp.gt.f32.partialorder %v4918_v27, 0.0 }
 0x296   :  { %3881 = vpow2.f32 %v1558_v7  ;;  %v1464_v54 = vmin.f32 %v4923_v40, 0.0  ;;  %v3396_v52 = vpop.f32.mrb[68].mxu1  ;;  %v1713_v25 = vsel %vm1393_vm11, %v4870_v53, %v2584_v13  ;;  %vm1400_vm2 = vcmp.gt.f32.partialorder %v4923_v40, 0.0 }
 0x297   :  { %v3872_v51 = vpop.eup %3871  ;;  %v1564_v42 = vmul.f32 1.442695, %v1465_v32  ;;  %v4930_v33 = vadd.f32 %v3396_v52, %v4740_v16  ;;  %v1227_v12 = vpop.f32.mrb[69].mxu1  ;;  %v1712_v57 = vsel %vm1392_vm10, %v4875_v18, %v2583_v23 }
 0x298   :  { %v3874_v15 = vpop.eup %3873  ;;  %v1562_v39 = vmul.f32 1.442695, %v1464_v54  ;;  %v4935_v58 = vadd.f32 %v4740_v16, %v1227_v12  ;;  %3507 = vmatprep.mubr.f32.mxu0 %v1712_v57  ;;  %v2586_v31 = vadd.f32 -1.0, %v3872_v51 }
 0x299   :  { %3883 = vpow2.f32 %v1564_v42  ;;  %v1467_v3 = vmin.f32 %v4930_v33, 0.0  ;;  %3508 = vmatmul.mubr.f32.gmra.mrb[58].mxu0 %v1713_v25  ;;  %v2585_v29 = vadd.f32 -1.0, %v3874_v15  ;;  %vm1403_vm5 = vcmp.gt.f32.partialorder %v4930_v33, 0.0 }
 0x29a   :  { %3885 = vpow2.f32 %v1562_v39  ;;  %v1466_v28 = vmin.f32 %v4935_v58, 0.0  ;;  %v3399_v18 = vpop.f32.mrb[70].mxu1  ;;  %v1715_v45 = vsel %vm1395_vm13, %v4882_v20, %v2586_v31  ;;  %vm1402_vm4 = vcmp.gt.f32.partialorder %v4935_v58, 0.0 }
 0x29b   :  { %v3876_v50 = vpop.eup %3875  ;;  %v1568_v21 = vmul.f32 1.442695, %v1467_v3  ;;  %v4942_v48 = vadd.f32 %v3399_v18, %v4740_v16  ;;  %v1237_v41 = vpop.f32.mrb[71].mxu1  ;;  %v1714_v53 = vsel %vm1394_vm12, %v4887_v49, %v2585_v29 }
 0x29c   :  { %v3878_v36 = vpop.eup %3877  ;;  %v1566_v26 = vmul.f32 1.442695, %v1466_v28  ;;  %v4947_v19 = vadd.f32 %v4740_v16, %v1237_v41  ;;  %3510 = vmatprep.mubr.f32.mxu0 %v1714_v53  ;;  %v2588_v34 = vadd.f32 -1.0, %v3876_v50 }
 0x29d   :  { %3887 = vpow2.f32 %v1568_v21  ;;  %v1469_v43 = vmin.f32 %v4942_v48, 0.0  ;;  %3511 = vmatmul.mubr.f32.gmra.mrb[60].mxu0 %v1715_v45  ;;  %v2587_v62 = vadd.f32 -1.0, %v3878_v36  ;;  %vm1405_vm7 = vcmp.gt.f32.partialorder %v4942_v48, 0.0 }
 0x29e   :  { %3889 = vpow2.f32 %v1566_v26  ;;  %v1468_v8 = vmin.f32 %v4947_v19, 0.0  ;;  %v3402_v49 = vpop.f32.mrb[72].mxu1  ;;  %v1717_v60 = vsel %vm1397_vm15, %v4894_v5, %v2588_v34  ;;  %vm1404_vm6 = vcmp.gt.f32.partialorder %v4947_v19, 0.0 }
 0x29f   :  { %v3880_v63 = vpop.eup %3879  ;;  %v1572_v2 = vmul.f32 1.442695, %v1469_v43  ;;  %v4954_v11 = vadd.f32 %v3402_v49, %v4740_v16  ;;  %v1247_v6 = vpop.f32.mrb[73].mxu1  ;;  %v1716_v20 = vsel %vm1396_vm14, %v4899_v0, %v2587_v62 }
 0x2a0   :  { %v3882_v10 = vpop.eup %3881  ;;  %v1570_v44 = vmul.f32 1.442695, %v1468_v8  ;;  %v4959_v17 = vadd.f32 %v4740_v16, %v1247_v6  ;;  %3513 = vmatprep.mubr.f32.mxu0 %v1716_v20  ;;  %v2590_v38 = vadd.f32 -1.0, %v3880_v63 }
 0x2a1   :  { %3891 = vpow2.f32 %v1572_v2  ;;  %v1471_v46 = vmin.f32 %v4954_v11, 0.0  ;;  %3514 = vmatmul.mubr.f32.gmra.mrb[62].mxu0 %v1717_v60  ;;  %v2589_v4 = vadd.f32 -1.0, %v3882_v10  ;;  %vm1407_vm9 = vcmp.gt.f32.partialorder %v4954_v11, 0.0 }
 0x2a2   :  { %3893 = vpow2.f32 %v1570_v44  ;;  %v1470_v47 = vmin.f32 %v4959_v17, 0.0  ;;  %v3405_v0 = vpop.f32.mrb[74].mxu1  ;;  %v1719_v9 = vsel %vm1399_vm1, %v4906_v61, %v2590_v38  ;;  %vm1406_vm8 = vcmp.gt.f32.partialorder %v4959_v17, 0.0 }
 0x2a3   :  { %v3884_v24 = vpop.eup %3883  ;;  %v1576_v14 = vmul.f32 1.442695, %v1471_v46  ;;  %v4966_v1 = vadd.f32 %v3405_v0, %v4740_v16  ;;  %v1257_v37 = vpop.f32.mrb[75].mxu1  ;;  %v1718_v5 = vsel %vm1398_vm0, %v4911_v35, %v2589_v4 }
 0x2a4   :  { %v3886_v22 = vpop.eup %3885  ;;  %v1574_v59 = vmul.f32 1.442695, %v1470_v47  ;;  %v4971_v56 = vadd.f32 %v4740_v16, %v1257_v37  ;;  %3516 = vmatprep.mubr.f32.mxu0 %v1718_v5  ;;  %v2592_v55 = vadd.f32 -1.0, %v3884_v24 }
 0x2a5   :  { %3895 = vpow2.f32 %v1576_v14  ;;  %v1473_v7 = vmin.f32 %v4966_v1, 0.0  ;;  %3517 = vmatmul.mubr.f32.gmra.mrb[64].mxu0 %v1719_v9  ;;  %v2591_v30 = vadd.f32 -1.0, %v3886_v22  ;;  %vm1409_vm11 = vcmp.gt.f32.partialorder %v4966_v1, 0.0 }
 0x2a6   :  { %3897 = vpow2.f32 %v1574_v59  ;;  %v1472_v13 = vmin.f32 %v4971_v56, 0.0  ;;  %v3408_v35 = vpop.f32.mrb[76].mxu1  ;;  %v1721_v57 = vsel %vm1401_vm3, %v4918_v27, %v2592_v55  ;;  %vm1408_vm10 = vcmp.gt.f32.partialorder %v4971_v56, 0.0 }
 0x2a7   :  { %v3888_v32 = vpop.eup %3887  ;;  %v1580_v23 = vmul.f32 1.442695, %v1473_v7  ;;  %v4978_v54 = vadd.f32 %v3408_v35, %v4740_v16  ;;  %v1267_v52 = vpop.f32.mrb[77].mxu1  ;;  %v1720_v61 = vsel %vm1400_vm2, %v4923_v40, %v2591_v30 }
 0x2a8   :  { %v3890_v51 = vpop.eup %3889  ;;  %v1578_v42 = vmul.f32 1.442695, %v1472_v13  ;;  %v4983_v12 = vadd.f32 %v4740_v16, %v1267_v52  ;;  %3519 = vmatprep.mubr.f32.mxu0 %v1720_v61  ;;  %v2594_v15 = vadd.f32 -1.0, %v3888_v32 }
 0x2a9   :  { %3899 = vpow2.f32 %v1580_v23  ;;  %v1475_v39 = vmin.f32 %v4978_v54, 0.0  ;;  %3520 = vmatmul.mubr.f32.gmra.mrb[66].mxu0 %v1721_v57  ;;  %v2593_v25 = vadd.f32 -1.0, %v3890_v51  ;;  %vm1411_vm13 = vcmp.gt.f32.partialorder %v4978_v54, 0.0 }
 0x2aa   :  { %3901 = vpow2.f32 %v1578_v42  ;;  %v1474_v31 = vmin.f32 %v4983_v12, 0.0  ;;  %v3411_v40 = vpop.f32.mrb[78].mxu1  ;;  %v1723_v53 = vsel %vm1403_vm5, %v4930_v33, %v2594_v15  ;;  %vm1410_vm12 = vcmp.gt.f32.partialorder %v4983_v12, 0.0 }
 0x2ab   :  { %v3892_v3 = vpop.eup %3891  ;;  %v1584_v29 = vmul.f32 1.442695, %v1475_v39  ;;  %v4990_v28 = vadd.f32 %v3411_v40, %v4740_v16  ;;  %v1277_v18 = vpop.f32.mrb[79].mxu1  ;;  %v1722_v27 = vsel %vm1402_vm4, %v4935_v58, %v2593_v25 }
 0x2ac   :  { %v3894_v50 = vpop.eup %3893  ;;  %v1582_v21 = vmul.f32 1.442695, %v1474_v31  ;;  %v4995_v41 = vadd.f32 %v4740_v16, %v1277_v18  ;;  %3522 = vmatprep.mubr.f32.mxu0 %v1722_v27  ;;  %v2596_v36 = vadd.f32 -1.0, %v3892_v3 }
 0x2ad   :  { %3903 = vpow2.f32 %v1584_v29  ;;  %v1477_v26 = vmin.f32 %v4990_v28, 0.0  ;;  %3523 = vmatmul.mubr.f32.gmra.mrb[68].mxu0 %v1723_v53  ;;  %v2595_v45 = vadd.f32 -1.0, %v3894_v50  ;;  %vm1413_vm15 = vcmp.gt.f32.partialorder %v4990_v28, 0.0 }
 0x2ae   :  { %3905 = vpow2.f32 %v1582_v21  ;;  %v1476_v34 = vmin.f32 %v4995_v41, 0.0  ;;  %v3414_v58 = vpop.f32.mrb[80].mxu1  ;;  %v1725_v20 = vsel %vm1405_vm7, %v4942_v48, %v2596_v36  ;;  %vm1412_vm14 = vcmp.gt.f32.partialorder %v4995_v41, 0.0 }
 0x2af   :  { %v3896_v43 = vpop.eup %3895  ;;  %v1588_v62 = vmul.f32 1.442695, %v1477_v26  ;;  %v5002_v8 = vadd.f32 %v3414_v58, %v4740_v16  ;;  %v1287_v49 = vpop.f32.mrb[81].mxu1  ;;  %v1724_v33 = vsel %vm1404_vm6, %v4947_v19, %v2595_v45 }
 0x2b0   :  { %v3898_v63 = vpop.eup %3897  ;;  %v1586_v2 = vmul.f32 1.442695, %v1476_v34  ;;  %v5007_v6 = vadd.f32 %v4740_v16, %v1287_v49  ;;  %3525 = vmatprep.mubr.f32.mxu0 %v1724_v33  ;;  %v2598_v10 = vadd.f32 -1.0, %v3896_v43  ;;  %v5049_v34 = vld [vmem:[#allocation10] ss:$0 sm:$0xff] }
 0x2b1   :  { %3907 = vpow2.f32 %v1588_v62  ;;  %v1479_v44 = vmin.f32 %v5002_v8, 0.0  ;;  %3526 = vmatmul.mubr.f32.gmra.mrb[70].mxu0 %v1725_v20  ;;  %v2597_v60 = vadd.f32 -1.0, %v3898_v63  ;;  %vm1415_vm1 = vcmp.gt.f32.partialorder %v5002_v8, 0.0 }
 0x2b2   :  { %3909 = vpow2.f32 %v1586_v2  ;;  %v1478_v38 = vmin.f32 %v5007_v6, 0.0  ;;  %v3417_v19 = vpop.f32.mrb[82].mxu1  ;;  %v1727_v5 = vsel %vm1407_vm9, %v4954_v11, %v2598_v10  ;;  %vm1414_vm0 = vcmp.gt.f32.partialorder %v5007_v6, 0.0 }
 0x2b3   :  { %v3900_v46 = vpop.eup %3899  ;;  %v1592_v4 = vmul.f32 1.442695, %v1479_v44  ;;  %v5014_v47 = vadd.f32 %v3417_v19, %v4740_v16  ;;  %v1297_v0 = vpop.f32.mrb[83].mxu1  ;;  %v1726_v48 = vsel %vm1406_vm8, %v4959_v17, %v2597_v60 }
 0x2b4   :  { %v3902_v24 = vpop.eup %3901  ;;  %v1590_v14 = vmul.f32 1.442695, %v1478_v38  ;;  %v5019_v37 = vadd.f32 %v4740_v16, %v1297_v0  ;;  %3528 = vmatprep.mubr.f32.mxu0 %v1726_v48  ;;  %v2600_v22 = vadd.f32 -1.0, %v3900_v46 }
 0x2b5   :  { %3911 = vpow2.f32 %v1592_v4  ;;  %v1481_v59 = vmin.f32 %v5014_v47, 0.0  ;;  %3529 = vmatmul.mubr.f32.gmra.mrb[72].mxu0 %v1727_v5  ;;  %v2599_v9 = vadd.f32 -1.0, %v3902_v24  ;;  %vm1417_vm3 = vcmp.gt.f32.partialorder %v5014_v47, 0.0 }
 0x2b6   :  { %3913 = vpow2.f32 %v1590_v14  ;;  %v1480_v55 = vmin.f32 %v5019_v37, 0.0  ;;  %v3420_v17 = vpop.f32.mrb[84].mxu1  ;;  %v1729_v61 = vsel %vm1409_vm11, %v4966_v1, %v2600_v22  ;;  %vm1416_vm2 = vcmp.gt.f32.partialorder %v5019_v37, 0.0 }
 0x2b7   :  { %v3904_v7 = vpop.eup %3903  ;;  %v1596_v30 = vmul.f32 1.442695, %v1481_v59  ;;  %v5026_v13 = vadd.f32 %v3420_v17, %v4740_v16  ;;  %v1307_v35 = vpop.f32.mrb[85].mxu1  ;;  %v1728_v11 = vsel %vm1408_vm10, %v4971_v56, %v2599_v9 }
 0x2b8   :  { %v3906_v32 = vpop.eup %3905  ;;  %v1594_v23 = vmul.f32 1.442695, %v1480_v55  ;;  %v5031_v52 = vadd.f32 %v4740_v16, %v1307_v35  ;;  %3531 = vmatprep.mubr.f32.mxu0 %v1728_v11  ;;  %v2602_v51 = vadd.f32 -1.0, %v3904_v7 }
 0x2b9   :  { %3915 = vpow2.f32 %v1596_v30  ;;  %v1483_v42 = vmin.f32 %v5026_v13, 0.0  ;;  %3532 = vmatmul.mubr.f32.gmra.mrb[74].mxu0 %v1729_v61  ;;  %v2601_v57 = vadd.f32 -1.0, %v3906_v32  ;;  %vm1419_vm5 = vcmp.gt.f32.partialorder %v5026_v13, 0.0 }
 0x2ba   :  { %3917 = vpow2.f32 %v1594_v23  ;;  %v1482_v15 = vmin.f32 %v5031_v52, 0.0  ;;  %v3423_v56 = vpop.f32.mrb[86].mxu1  ;;  %v1731_v27 = vsel %vm1411_vm13, %v4978_v54, %v2602_v51  ;;  %vm1418_vm4 = vcmp.gt.f32.partialorder %v5031_v52, 0.0 }
 0x2bb   :  { %v3908_v39 = vpop.eup %3907  ;;  %v1600_v25 = vmul.f32 1.442695, %v1483_v42  ;;  %v5038_v31 = vadd.f32 %v3423_v56, %v4740_v16  ;;  %v1317_v40 = vpop.f32.mrb[87].mxu1  ;;  %v1730_v1 = vsel %vm1410_vm12, %v4983_v12, %v2601_v57 }
 0x2bc   :  { %v3910_v3 = vpop.eup %3909  ;;  %v1598_v29 = vmul.f32 1.442695, %v1482_v15  ;;  %v5043_v18 = vadd.f32 %v4740_v16, %v1317_v40  ;;  %3534 = vmatprep.mubr.f32.mxu0 %v1730_v1  ;;  %v2604_v50 = vadd.f32 -1.0, %v3908_v39 }
 0x2bd   :  { %3919 = vpow2.f32 %v1600_v25  ;;  %v1485_v21 = vmin.f32 %v5038_v31, 0.0  ;;  %3535 = vmatmul.mubr.f32.gmra.mrb[76].mxu0 %v1731_v27  ;;  %v2603_v53 = vadd.f32 -1.0, %v3910_v3  ;;  %vm1421_vm7 = vcmp.gt.f32.partialorder %v5038_v31, 0.0 }
 0x2be   :  { %3921 = vpow2.f32 %v1598_v29  ;;  %v1484_v36 = vmin.f32 %v5043_v18, 0.0  ;;  %v3426_v12 = vpop.f32.mrb[88].mxu1  ;;  %v1733_v33 = vsel %vm1413_vm15, %v4990_v28, %v2604_v50  ;;  %vm1420_vm6 = vcmp.gt.f32.partialorder %v5043_v18, 0.0 }
 0x2bf   :  { %v3912_v26 = vpop.eup %3911  ;;  %v1604_v45 = vmul.f32 1.442695, %v1485_v21  ;;  %v5052_v16 = vadd.f32 %v5049_v34, %v3426_v12  ;;  %v1327_v54 = vpop.f32.mrb[89].mxu1  ;;  %v1732_v58 = vsel %vm1412_vm14, %v4995_v41, %v2603_v53 }
 0x2c0   :  { %v3914_v43 = vpop.eup %3913  ;;  %v1602_v62 = vmul.f32 1.442695, %v1484_v36  ;;  %v5057_v49 = vadd.f32 %v5049_v34, %v1327_v54  ;;  %3537 = vmatprep.mubr.f32.mxu0 %v1732_v58  ;;  %v2606_v63 = vadd.f32 -1.0, %v3912_v26 }
 0x2c1   :  { %3923 = vpow2.f32 %v1604_v45  ;;  %v1487_v2 = vmin.f32 %v5052_v16, 0.0  ;;  %3538 = vmatmul.mubr.f32.gmra.mrb[78].mxu0 %v1733_v33  ;;  %v2605_v20 = vadd.f32 -1.0, %v3914_v43  ;;  %vm1423_vm9 = vcmp.gt.f32.partialorder %v5052_v16, 0.0 }
 0x2c2   :  { %3925 = vpow2.f32 %v1602_v62  ;;  %v1486_v10 = vmin.f32 %v5057_v49, 0.0  ;;  %v3429_v41 = vpop.f32.mrb[90].mxu1  ;;  %v1735_v48 = vsel %vm1415_vm1, %v5002_v8, %v2606_v63  ;;  %vm1422_vm8 = vcmp.gt.f32.partialorder %v5057_v49, 0.0 }
 0x2c3   :  { %v3916_v44 = vpop.eup %3915  ;;  %v1608_v60 = vmul.f32 1.442695, %v1487_v2  ;;  %v5064_v38 = vadd.f32 %v5049_v34, %v3429_v41  ;;  %v1337_v19 = vpop.f32.mrb[91].mxu1  ;;  %v1734_v28 = vsel %vm1414_vm0, %v5007_v6, %v2605_v20 }
 0x2c4   :  { %v3918_v46 = vpop.eup %3917  ;;  %v1606_v4 = vmul.f32 1.442695, %v1486_v10  ;;  %v5069_v0 = vadd.f32 %v5049_v34, %v1337_v19  ;;  %3540 = vmatprep.mubr.f32.mxu0 %v1734_v28  ;;  %v2608_v24 = vadd.f32 -1.0, %v3916_v44 }
 0x2c5   :  { %3927 = vpow2.f32 %v1608_v60  ;;  %v1489_v14 = vmin.f32 %v5064_v38, 0.0  ;;  %3541 = vmatmul.mubr.f32.gmra.mrb[80].mxu0 %v1735_v48  ;;  %v2607_v5 = vadd.f32 -1.0, %v3918_v46  ;;  %vm1425_vm11 = vcmp.gt.f32.partialorder %v5064_v38, 0.0 }
 0x2c6   :  { %3929 = vpow2.f32 %v1606_v4  ;;  %v1488_v22 = vmin.f32 %v5069_v0, 0.0  ;;  %v3432_v6 = vpop.f32.mrb[92].mxu1  ;;  %v1737_v11 = vsel %vm1417_vm3, %v5014_v47, %v2608_v24  ;;  %vm1424_vm10 = vcmp.gt.f32.partialorder %v5069_v0, 0.0 }
 0x2c7   :  { %v3920_v59 = vpop.eup %3919  ;;  %v1612_v9 = vmul.f32 1.442695, %v1489_v14  ;;  %v5076_v55 = vadd.f32 %v5049_v34, %v3432_v6  ;;  %v1347_v17 = vpop.f32.mrb[93].mxu1  ;;  %v1736_v8 = vsel %vm1416_vm2, %v5019_v37, %v2607_v5 }
 0x2c8   :  { %v3922_v7 = vpop.eup %3921  ;;  %v1610_v30 = vmul.f32 1.442695, %v1488_v22  ;;  %v5081_v35 = vadd.f32 %v5049_v34, %v1347_v17  ;;  %3543 = vmatprep.mubr.f32.mxu0 %v1736_v8  ;;  %v2610_v32 = vadd.f32 -1.0, %v3920_v59 }
 0x2c9   :  { %3931 = vpow2.f32 %v1612_v9  ;;  %v1491_v23 = vmin.f32 %v5076_v55, 0.0  ;;  %3544 = vmatmul.mubr.f32.gmra.mrb[82].mxu0 %v1737_v11  ;;  %v2609_v61 = vadd.f32 -1.0, %v3922_v7  ;;  %vm1427_vm13 = vcmp.gt.f32.partialorder %v5076_v55, 0.0 }
 0x2ca   :  { %3933 = vpow2.f32 %v1610_v30  ;;  %v1490_v51 = vmin.f32 %v5081_v35, 0.0  ;;  %v3435_v37 = vpop.f32.mrb[94].mxu1  ;;  %v1739_v1 = vsel %vm1419_vm5, %v5026_v13, %v2610_v32  ;;  %vm1426_vm12 = vcmp.gt.f32.partialorder %v5081_v35, 0.0 }
 0x2cb   :  { %v3924_v42 = vpop.eup %3923  ;;  %v1616_v57 = vmul.f32 1.442695, %v1491_v23  ;;  %v5088_v15 = vadd.f32 %v5049_v34, %v3435_v37  ;;  %v1357_v56 = vpop.f32.mrb[95].mxu1  ;;  %v1738_v47 = vsel %vm1418_vm4, %v5031_v52, %v2609_v61 }
 0x2cc   :  { %v3926_v39 = vpop.eup %3925  ;;  %v1614_v25 = vmul.f32 1.442695, %v1490_v51  ;;  %v1358_v40 = vadd.f32 %v5049_v34, %v1357_v56  ;;  %3546 = vmatprep.mubr.f32.mxu0 %v1738_v47  ;;  %v2612_v3 = vadd.f32 -1.0, %v3924_v42 }
 0x2cd   :  { %3935 = vpow2.f32 %v1616_v57  ;;  %v1493_v29 = vmin.f32 %v5088_v15, 0.0  ;;  %3547 = vmatmul.mubr.f32.gmra.mrb[84].mxu0 %v1739_v1  ;;  %v2611_v27 = vadd.f32 -1.0, %v3926_v39  ;;  %vm1429_vm15 = vcmp.gt.f32.partialorder %v5088_v15, 0.0 }
 0x2ce   :  { %3937 = vpow2.f32 %v1614_v25  ;;  %v1492_v50 = vmin.f32 %v1358_v40, 0.0  ;;  %v1741_v13 = vsel %vm1421_vm7, %v5038_v31, %v2612_v3  ;;  %vm1428_vm14 = vcmp.gt.f32.partialorder %v1358_v40, 0.0 }
 0x2cf   :  { %v3928_v52 = vpop.eup %3927  ;;  %v1620_v21 = vmul.f32 1.442695, %v1493_v29  ;;  %v1740_v53 = vsel %vm1420_vm6, %v5043_v18, %v2611_v27 }
 0x2d0   :  { %v3930_v36 = vpop.eup %3929  ;;  %v1618_v12 = vmul.f32 1.442695, %v1492_v50  ;;  %3549 = vmatprep.mubr.f32.mxu0 %v1740_v53  ;;  %v2614_v26 = vadd.f32 -1.0, %v3928_v52 }
 0x2d1   :  { %3939 = vpow2.f32 %v1620_v21  ;;  %3550 = vmatmul.mubr.f32.gmra.mrb[86].mxu0 %v1741_v13  ;;  %v2613_v45 = vadd.f32 -1.0, %v3930_v36 }
 0x2d2   :  { %3941 = vpow2.f32 %v1618_v12  ;;  %v1743_v58 = vsel %vm1423_vm9, %v5052_v16, %v2614_v26 }
 0x2d3   :  { %v3932_v34 = vpop.eup %3931  ;;  %v1742_v54 = vsel %vm1422_vm8, %v5057_v49, %v2613_v45 }
 0x2d4   :  { %v3934_v18 = vpop.eup %3933  ;;  %3552 = vmatprep.mubr.f32.mxu0 %v1742_v54  ;;  %v2616_v43 = vadd.f32 -1.0, %v3932_v34 }
 0x2d5   :  { %3553 = vmatmul.mubr.f32.gmra.mrb[88].mxu0 %v1743_v58  ;;  %v2615_v62 = vadd.f32 -1.0, %v3934_v18 }
 0x2d6   :  { %v1745_v49 = vsel %vm1425_vm11, %v5064_v38, %v2616_v43 }
 0x2d7   :  { %v3936_v31 = vpop.eup %3935  ;;  %v1744_v33 = vsel %vm1424_vm10, %v5069_v0, %v2615_v62 }
 0x2d8   :  { %v3938_v63 = vpop.eup %3937  ;;  %3555 = vmatprep.mubr.f32.mxu0 %v1744_v33  ;;  %v2618_v2 = vadd.f32 -1.0, %v3936_v31 }
 0x2d9   :  { %3556 = vmatmul.mubr.f32.gmra.mrb[90].mxu0 %v1745_v49  ;;  %v2617_v20 = vadd.f32 -1.0, %v3938_v63 }
 0x2da   :  { %v1747_v44 = vsel %vm1427_vm13, %v5076_v55, %v2618_v2 }
 0x2db   :  { %v3940_v16 = vpop.eup %3939  ;;  %v1746_v10 = vsel %vm1426_vm12, %v5081_v35, %v2617_v20 }
 0x2dc   :  { %v3942_v41 = vpop.eup %3941  ;;  %3558 = vmatprep.mubr.f32.mxu0 %v1746_v10  ;;  %v2620_v60 = vadd.f32 -1.0, %v3940_v16 }
 0x2dd   :  { %3559 = vmatmul.mubr.f32.gmra.mrb[92].mxu0 %v1747_v44  ;;  %v2619_v19 = vadd.f32 -1.0, %v3942_v41 }
 0x2de   :  { %v1749_v38 = vsel %vm1429_vm15, %v5088_v15, %v2620_v60 }
 0x2df   :  { %v1748_v28 = vsel %vm1428_vm14, %v1358_v40, %v2619_v19 }
 0x2e0   :  { %3561 = vmatprep.mubr.f32.mxu0 %v1748_v28 }
 0x2e1   :  { %3562 = vmatmul.mubr.f32.gmra.mrb[94].mxu0 %v1749_v38 }
 0x338   :  { %v3470_v46 = vpop.f32.mrb[32].mxu0 }
 0x339   :  { %v1832_v4 = vpop.f32.mrb[33].mxu0 }
 0x33a   :  { %v2752_v0 = vpack.c.bf16 %v3470_v46, %v1832_v4 }
 0x33c   :  { %2753 = vst [vmem:[#allocation13] sm:$0xff] %v2752_v0   ;;  %v3473_v48 = vpop.f32.mrb[34].mxu0 }
 0x33d   :  { %v1842_v24 = vpop.f32.mrb[35].mxu0 }
 0x33e   :  { %v2757_v14 = vpack.c.bf16 %v3473_v48, %v1842_v24 }
 0x340   :  { %2909 = vst [vmem:[#allocation13 + $0x8] sm:$0xff] %v2757_v14   ;;  %v3476_v5 = vpop.f32.mrb[36].mxu0 }
 0x341   :  { %v1852_v22 = vpop.f32.mrb[37].mxu0 }
 0x342   :  { %v2762_v6 = vpack.c.bf16 %v3476_v5, %v1852_v22 }
 0x344   :  { %2910 = vst [vmem:[#allocation13 + $0x10] sm:$0xff] %v2762_v6   ;;  %v3479_v59 = vpop.f32.mrb[38].mxu0 }
 0x345   :  { %v1862_v9 = vpop.f32.mrb[39].mxu0 }
 0x346   :  { %v2767_v55 = vpack.c.bf16 %v3479_v59, %v1862_v9 }
 0x348   :  { %2911 = vst [vmem:[#allocation13 + $0x18] sm:$0xff] %v2767_v55   ;;  %v3482_v17 = vpop.f32.mrb[40].mxu0 }
 0x349   :  { %v1872_v8 = vpop.f32.mrb[41].mxu0 }
 0x34a   :  { %v2772_v7 = vpack.c.bf16 %v3482_v17, %v1872_v8 }
 0x34c   :  { %2912 = vst [vmem:[#allocation13 + $0x20] sm:$0xff] %v2772_v7   ;;  %v3485_v30 = vpop.f32.mrb[42].mxu0 }
 0x34d   :  { %v1882_v35 = vpop.f32.mrb[43].mxu0 }
 0x34e   :  { %v2777_v11 = vpack.c.bf16 %v3485_v30, %v1882_v35 }
 0x350   :  { %2913 = vst [vmem:[#allocation13 + $0x28] sm:$0xff] %v2777_v11   ;;  %v3488_v32 = vpop.f32.mrb[44].mxu0 }
 0x351   :  { %v1892_v23 = vpop.f32.mrb[45].mxu0 }
 0x352   :  { %v2782_v61 = vpack.c.bf16 %v3488_v32, %v1892_v23 }
 0x354   :  { %2914 = vst [vmem:[#allocation13 + $0x30] sm:$0xff] %v2782_v61   ;;  %v3491_v51 = vpop.f32.mrb[46].mxu0 }
 0x355   :  { %v1902_v37 = vpop.f32.mrb[47].mxu0 }
 0x356   :  { %v2787_v42 = vpack.c.bf16 %v3491_v51, %v1902_v37 }
 0x358   :  { %2915 = vst [vmem:[#allocation13 + $0x38] sm:$0xff] %v2787_v42   ;;  %v3494_v57 = vpop.f32.mrb[48].mxu0 }
 0x359   :  { %v1912_v15 = vpop.f32.mrb[49].mxu0 }
 0x35a   :  { %v2792_v56 = vpack.c.bf16 %v3494_v57, %v1912_v15 }
 0x35c   :  { %2916 = vst [vmem:[#allocation13 + $0x40] sm:$0xff] %v2792_v56   ;;  %v3497_v47 = vpop.f32.mrb[50].mxu0 }
 0x35d   :  { %v1922_v39 = vpop.f32.mrb[51].mxu0 }
 0x35e   :  { %v2797_v25 = vpack.c.bf16 %v3497_v47, %v1922_v39 }
 0x360   :  { %2917 = vst [vmem:[#allocation13 + $0x48] sm:$0xff] %v2797_v25   ;;  %v3500_v40 = vpop.f32.mrb[52].mxu0 }
 0x361   :  { %v1932_v1 = vpop.f32.mrb[53].mxu0 }
 0x362   :  { %v2802_v3 = vpack.c.bf16 %v3500_v40, %v1932_v1 }
 0x364   :  { %2918 = vst [vmem:[#allocation13 + $0x50] sm:$0xff] %v2802_v3   ;;  %v3503_v29 = vpop.f32.mrb[54].mxu0 }
 0x365   :  { %v1942_v27 = vpop.f32.mrb[55].mxu0 }
 0x366   :  { %v2807_v50 = vpack.c.bf16 %v3503_v29, %v1942_v27 }
 0x368   :  { %2919 = vst [vmem:[#allocation13 + $0x58] sm:$0xff] %v2807_v50   ;;  %v3506_v52 = vpop.f32.mrb[56].mxu0 }
 0x369   :  { %v1952_v21 = vpop.f32.mrb[57].mxu0 }
 0x36a   :  { %v2812_v53 = vpack.c.bf16 %v3506_v52, %v1952_v21 }
 0x36c   :  { %2920 = vst [vmem:[#allocation13 + $0x60] sm:$0xff] %v2812_v53   ;;  %v3509_v36 = vpop.f32.mrb[58].mxu0 }
 0x36d   :  { %v1962_v12 = vpop.f32.mrb[59].mxu0 }
 0x36e   :  { %v2817_v13 = vpack.c.bf16 %v3509_v36, %v1962_v12 }
 0x370   :  { %2921 = vst [vmem:[#allocation13 + $0x68] sm:$0xff] %v2817_v13   ;;  %v3512_v26 = vpop.f32.mrb[60].mxu0 }
 0x371   :  { %v1972_v45 = vpop.f32.mrb[61].mxu0 }
 0x372   :  { %v2822_v34 = vpack.c.bf16 %v3512_v26, %v1972_v45 }
 0x374   :  { %2922 = vst [vmem:[#allocation13 + $0x70] sm:$0xff] %v2822_v34   ;;  %v3515_v54 = vpop.f32.mrb[62].mxu0 }
 0x375   :  { %v1982_v18 = vpop.f32.mrb[63].mxu0 }
 0x376   :  { %v2827_v58 = vpack.c.bf16 %v3515_v54, %v1982_v18 }
 0x378   :  { %2923 = vst [vmem:[#allocation13 + $0x78] sm:$0xff] %v2827_v58   ;;  %v3518_v43 = vpop.f32.mrb[64].mxu0 }
 0x379   :  { %v1992_v62 = vpop.f32.mrb[65].mxu0 }
 0x37a   :  { %v2832_v31 = vpack.c.bf16 %v3518_v43, %v1992_v62 }
 0x37c   :  { %2924 = vst [vmem:[#allocation13 + $0x80] sm:$0xff] %v2832_v31   ;;  %v3521_v33 = vpop.f32.mrb[66].mxu0 }
 0x37d   :  { %v2002_v63 = vpop.f32.mrb[67].mxu0 }
 0x37e   :  { %v2837_v49 = vpack.c.bf16 %v3521_v33, %v2002_v63 }
 0x380   :  { %2925 = vst [vmem:[#allocation13 + $0x88] sm:$0xff] %v2837_v49   ;;  %v3524_v2 = vpop.f32.mrb[68].mxu0 }
 0x381   :  { %v2012_v20 = vpop.f32.mrb[69].mxu0 }
 0x382   :  { %v2842_v16 = vpack.c.bf16 %v3524_v2, %v2012_v20 }
 0x384   :  { %2926 = vst [vmem:[#allocation13 + $0x90] sm:$0xff] %v2842_v16   ;;  %v3527_v10 = vpop.f32.mrb[70].mxu0 }
 0x385   :  { %v2022_v41 = vpop.f32.mrb[71].mxu0 }
 0x386   :  { %v2847_v44 = vpack.c.bf16 %v3527_v10, %v2022_v41 }
 0x388   :  { %2927 = vst [vmem:[#allocation13 + $0x98] sm:$0xff] %v2847_v44   ;;  %v3530_v60 = vpop.f32.mrb[72].mxu0 }
 0x389   :  { %v2032_v19 = vpop.f32.mrb[73].mxu0 }
 0x38a   :  { %v2852_v28 = vpack.c.bf16 %v3530_v60, %v2032_v19 }
 0x38c   :  { %2928 = vst [vmem:[#allocation13 + $0xa0] sm:$0xff] %v2852_v28   ;;  %v3533_v38 = vpop.f32.mrb[74].mxu0 }
 0x38d   :  { %v2042_v46 = vpop.f32.mrb[75].mxu0 }
 0x38e   :  { %v2857_v4 = vpack.c.bf16 %v3533_v38, %v2042_v46 }
 0x390   :  { %2929 = vst [vmem:[#allocation13 + $0xa8] sm:$0xff] %v2857_v4   ;;  %v3536_v0 = vpop.f32.mrb[76].mxu0 }
 0x391   :  { %v2052_v48 = vpop.f32.mrb[77].mxu0 }
 0x392   :  { %v2862_v24 = vpack.c.bf16 %v3536_v0, %v2052_v48 }
 0x394   :  { %2930 = vst [vmem:[#allocation13 + $0xb0] sm:$0xff] %v2862_v24   ;;  %v3539_v14 = vpop.f32.mrb[78].mxu0 }
 0x395   :  { %v2062_v5 = vpop.f32.mrb[79].mxu0 }
 0x396   :  { %v2867_v22 = vpack.c.bf16 %v3539_v14, %v2062_v5 }
 0x398   :  { %2931 = vst [vmem:[#allocation13 + $0xb8] sm:$0xff] %v2867_v22   ;;  %v3542_v6 = vpop.f32.mrb[80].mxu0 }
 0x399   :  { %v2072_v59 = vpop.f32.mrb[81].mxu0 }
 0x39a   :  { %v2872_v9 = vpack.c.bf16 %v3542_v6, %v2072_v59 }
 0x39c   :  { %2932 = vst [vmem:[#allocation13 + $0xc0] sm:$0xff] %v2872_v9   ;;  %v3545_v55 = vpop.f32.mrb[82].mxu0 }
 0x39d   :  { %v2082_v17 = vpop.f32.mrb[83].mxu0 }
 0x39e   :  { %v2877_v8 = vpack.c.bf16 %v3545_v55, %v2082_v17 }
 0x3a0   :  { %2933 = vst [vmem:[#allocation13 + $0xc8] sm:$0xff] %v2877_v8   ;;  %v3548_v7 = vpop.f32.mrb[84].mxu0 }
 0x3a1   :  { %v2092_v30 = vpop.f32.mrb[85].mxu0 }
 0x3a2   :  { %v2882_v35 = vpack.c.bf16 %v3548_v7, %v2092_v30 }
 0x3a4   :  { %2934 = vst [vmem:[#allocation13 + $0xd0] sm:$0xff] %v2882_v35   ;;  %v3551_v11 = vpop.f32.mrb[86].mxu0 }
 0x3a5   :  { %v2102_v32 = vpop.f32.mrb[87].mxu0 }
 0x3a6   :  { %v2887_v23 = vpack.c.bf16 %v3551_v11, %v2102_v32 }
 0x3a8   :  { %2935 = vst [vmem:[#allocation13 + $0xd8] sm:$0xff] %v2887_v23   ;;  %v3554_v61 = vpop.f32.mrb[88].mxu0 }
 0x3a9   :  { %v2112_v51 = vpop.f32.mrb[89].mxu0 }
 0x3aa   :  { %v2892_v37 = vpack.c.bf16 %v3554_v61, %v2112_v51 }
 0x3ac   :  { %2936 = vst [vmem:[#allocation13 + $0xe0] sm:$0xff] %v2892_v37   ;;  %v3557_v42 = vpop.f32.mrb[90].mxu0 }
 0x3ad   :  { %v2122_v57 = vpop.f32.mrb[91].mxu0 }
 0x3ae   :  { %v2897_v15 = vpack.c.bf16 %v3557_v42, %v2122_v57 }
 0x3b0   :  { %2937 = vst [vmem:[#allocation13 + $0xe8] sm:$0xff] %v2897_v15   ;;  %v3560_v56 = vpop.f32.mrb[92].mxu0 }
 0x3b1   :  { %v2132_v47 = vpop.f32.mrb[93].mxu0 }
 0x3b2   :  { %v2902_v39 = vpack.c.bf16 %v3560_v56, %v2132_v47 }
 0x3b4   :  { %2938 = vst [vmem:[#allocation13 + $0xf0] sm:$0xff] %v2902_v39   ;;  %v3563_v25 = vpop.f32.mrb[94].mxu0 }
 0x3b5   :  { %v2142_v40 = vpop.f32.mrb[95].mxu0 }
 0x3b6   :  { %v2907_v1 = vpack.c.bf16 %v3563_v25, %v2142_v40 }
 0x3b8   :  { %2939 = vst [vmem:[#allocation13 + $0xf8] sm:$0xff] %v2907_v1  }
 0x3b9   :  { %4088 = shalt.err (!%p4085_p10)
}
 0x3ba   :  { %s4089_s22 = scalar_lea.hbm %s5131_s6, 4096 }
 0x3bb   :  { %p4090_p11 = scmp.ne.s32.totalorder %s5131_s6, %s4089_s22  ;;  %p4093_p12 = scmp.lt.u32.totalorder %s4089_s22, %s5131_s6 }
 0x3bd   :  { %p4095_p13 = pnand %p4093_p12, %p4090_p11 }
 0x3bf   :  { %4098 = shalt.err (!%p4095_p13)
}
 0x3c0   :  { %s4118_s29 = smov 64   ;;  %s4119_s30 = smov 4  }
 0x3c1   :  { %2482 = dma.vmem_to_hbm [thread:$0]  %s2477_s9, 4096, %s5131_s6, [#allocation4], %s4118_s29, %s4118_s29, %s4119_s30  }
 0x3c2   :  { %4107 = dma.done.wait [#allocation4], 4096  }
 0x3c3   :  { %4108 = vsyncadd [#allocation4], 4294963200 }
 0x3c4   :  { %2486 = vsyncpa [#allocation3], 1 }
 0x3c5   :  { %2487 = vsyncpa [#allocation6], 1 }
 0x3c6   :  { %2488 = vsyncpa [#allocation9], 1 }
 0x3c7   :  { %2489 = vsyncpa [#allocation12], 1 }
 0x3c8   :  { %2490 = vsyncpa [#allocation4], 1 }

</bundles_post_ra>
